<compile_context>
chip_gen: v7x
topology: tpu7x:2x2x1
jax: 0.10.0
libtpu: 0.0.40
codegen_flags: <defaults>
</compile_context>

<pallas_src>
import math

import jax
import jax.numpy as jnp
from jax.experimental import pallas as pl
from jax.experimental.pallas import tpu as pltpu


# --------------------------------------------------------------------------------------
# Fused forward kernel: Gb graphs per grid step, everything VMEM-resident
# --------------------------------------------------------------------------------------
def _make_fused_kernel(num_gin_layers):
    def kernel(*refs):
        x_ref, adj_ref, gp_ref, oh_ref, mask_ref = refs[:5]
        i = 5
        gin_refs = refs[i:i + 4 * num_gin_layers]
        i += 4 * num_gin_layers
        wa1c_ref, wa1p_ref, ba1_ref, wa2_ref, ba2_ref = refs[i:i + 5]
        i += 5
        wc1_ref, bc1_ref, wc2_ref, bc2_ref = refs[i:i + 4]
        i += 4
        pi_ref, vv_ref = refs[i], refs[i + 1]

        Gb, N, _ = x_ref.shape            # graphs per step, nodes per graph
        n_j = oh_ref.shape[1]

        adj = adj_ref[...]                # (Gb, N, N) adjacency blocks (incl. self loops)
        h = x_ref[...]                    # (Gb, N, F) node features

        # --- GraphCNN: sum neighbor pooling + 2-layer MLP (BN folded) + ReLU ------------
        # neighbor pooling stays a batched einsum; the MLP matmuls run with Gb*N rows.
        for l in range(num_gin_layers):
            w1 = gin_refs[4 * l][...]
            b1 = gin_refs[4 * l + 1][...]
            w2 = gin_refs[4 * l + 2][...]
            b2 = gin_refs[4 * l + 3][...]
            pooled = jnp.einsum("bij,bjf->bif", adj, h,
                                preferred_element_type=jnp.float32)       # (Gb, N, F_in)
            pf = pooled.reshape(Gb * N, pooled.shape[-1])
            z = jnp.maximum(
                jnp.dot(pf, w1, preferred_element_type=jnp.float32) + b1, 0.0)
            hf = jnp.maximum(
                jnp.dot(z, w2, preferred_element_type=jnp.float32) + b2, 0.0)
            h = hf.reshape(Gb, N, hf.shape[-1])

        H = h.shape[-1]

        # --- graph pooling: (Gb,1,N)@(Gb,N,H) -> (Gb,H) ----------------------------------
        hp = jnp.einsum("bon,bnh->boh", gp_ref[...], h,
                        preferred_element_type=jnp.float32)[:, 0, :]      # (Gb, H)

        # --- both critics fused: (Gb,H)@(H,2Hc) then block-diag (2Hc,2) ------------------
        hc = jnp.tanh(jnp.dot(hp, wc1_ref[...], preferred_element_type=jnp.float32)
                      + bc1_ref[...])
        vv = jnp.dot(hc, wc2_ref[...], preferred_element_type=jnp.float32) + bc2_ref[...]
        vv_ref[...] = vv[:, None, :]                                      # (Gb, 1, 2)

        # --- actor: one-hot gather, concat-free split matmul, lane-dense softmax ---------
        cand = jnp.einsum("bjn,bnh->bjh", oh_ref[...], h,
                          preferred_element_type=jnp.float32)             # (Gb, n_j, H)
        cand_term = jnp.dot(cand.reshape(Gb * n_j, H), wa1c_ref[...],
                            preferred_element_type=jnp.float32)           # (Gb*n_j, Ha)
        Ha = cand_term.shape[-1]
        hp_term = jnp.dot(hp, wa1p_ref[...], preferred_element_type=jnp.float32)  # (Gb, Ha)
        ha = jnp.tanh(cand_term.reshape(Gb, n_j, Ha) + hp_term[:, None, :] + ba1_ref[...])
        s = (jnp.dot(ha.reshape(Gb * n_j, Ha), wa2_ref[...],
                     preferred_element_type=jnp.float32) + ba2_ref[...]).reshape(Gb, n_j)

        mask = mask_ref[...][:, 0, :]                                     # (Gb, n_j)
        s = jnp.where(mask != 0.0, -jnp.inf, s)
        m = jnp.max(s, axis=-1, keepdims=True)                            # lane-axis reduce
        e = jnp.exp(s - m)
        denom = jnp.sum(e, axis=-1, keepdims=True)
        pi = e * pl.reciprocal(denom, approx=True)
        pi_ref[...] = pi[:, None, :]                                      # (Gb, 1, n_j)

    return kernel


# --------------------------------------------------------------------------------------
# Gb sizing: fill the MXU, stay inside VMEM (conservative for v7x), keep grid >= 2
# --------------------------------------------------------------------------------------
_VMEM_BUDGET_BYTES = 24 * 1024 * 1024        # conservative vs v7x 64 MiB / TC
_VMEM_LIMIT_BYTES = 48 * 1024 * 1024         # explicit scoped limit (covers v5e 16 MiB default)


def _choose_graphs_per_step(B, N, F, H, n_j):
    # dominant per-graph bytes: double-buffered input blocks + live f32 intermediates
    per_graph = 4 * (2 * (N * N + n_j * N + N * F + N + n_j) + 3 * N * H + 2 * n_j * H)
    gb = max(1, _VMEM_BUDGET_BYTES // max(per_graph, 1))
    gb = min(gb, B)
    if B >= 2:
        gb = min(gb, max(1, B // 2))   # keep >= 2 grid steps so v7x can use both TCs
    return int(gb)


def _pad_batch(a, b_pad):
    b = a.shape[0]
    if b_pad == b:
        return a
    pad = [(0, b_pad - b)] + [(0, 0)] * (a.ndim - 1)
    return jnp.pad(a, pad)


# --------------------------------------------------------------------------------------
# pallas_call wrapper
# --------------------------------------------------------------------------------------
def fused_forward(x3, adj_blocks, gpool_w, cand_onehot, mask3, fp, graphs_per_step=None):
    B, N, F = x3.shape
    n_j = cand_onehot.shape[1]
    num_gin = len(fp["gin"])
    H = fp["gin"][-1]["w2"].shape[1]

    Gb = graphs_per_step or _choose_graphs_per_step(B, N, F, H, n_j)
    B_pad = int(math.ceil(B / Gb)) * Gb
    grid = (B_pad // Gb,)

    x3p = _pad_batch(x3, B_pad)
    adjp = _pad_batch(adj_blocks, B_pad)
    gpp = _pad_batch(gpool_w, B_pad)
    ohp = _pad_batch(cand_onehot, B_pad)
    maskp = _pad_batch(mask3, B_pad)

    weights = []
    for lp in fp["gin"]:
        weights += [lp["w1"], lp["b1"], lp["w2"], lp["b2"]]
    a = fp["actor"]
    weights += [a["w1c"], a["w1p"], a["b1"], a["w2"], a["b2"]]
    c = fp["critic"]
    weights += [c["w1"], c["b1"], c["w2"], c["b2"]]

    def wspec(w):  # weights pinned across the batch grid (constant block index)
        return pl.BlockSpec(w.shape, lambda b: (0, 0))

    in_specs = [
        pl.BlockSpec((Gb, N, F), lambda b: (b, 0, 0)),        # node features
        pl.BlockSpec((Gb, N, N), lambda b: (b, 0, 0)),        # adjacency blocks
        pl.BlockSpec((Gb, 1, N), lambda b: (b, 0, 0)),        # graph-pool weights
        pl.BlockSpec((Gb, n_j, N), lambda b: (b, 0, 0)),      # candidate one-hot
        pl.BlockSpec((Gb, 1, n_j), lambda b: (b, 0, 0)),      # mask (lane-dense)
    ] + [wspec(w) for w in weights]

    out_shape = (jax.ShapeDtypeStruct((B_pad, 1, n_j), jnp.float32),
                 jax.ShapeDtypeStruct((B_pad, 1, 2), jnp.float32))
    out_specs = (pl.BlockSpec((Gb, 1, n_j), lambda b: (b, 0, 0)),
                 pl.BlockSpec((Gb, 1, 2), lambda b: (b, 0, 0)))

    pi, vv = pl.pallas_call(
        _make_fused_kernel(num_gin),
        grid=grid,
        in_specs=in_specs,
        out_specs=out_specs,
        out_shape=out_shape,
        compiler_params=pltpu.CompilerParams(
            dimension_semantics=("parallel",),
            vmem_limit_bytes=_VMEM_LIMIT_BYTES),
    )(x3p, adjp, gpp, ohp, maskp, *weights)

    return pi[:B], vv[:B]


# --------------------------------------------------------------------------------------
# Parameter preparation: fold eval-mode BN, split actor W1, fuse the two critic heads
# --------------------------------------------------------------------------------------
def prepare_fused_params(params):
    gin = []
    for lp in params["gin"]:
        gin.append(dict(
            w1=lp["w1"] * lp["bn1_scale"], b1=lp["b1"] * lp["bn1_scale"] + lp["bn1_shift"],
            w2=lp["w2"] * lp["bn2_scale"], b2=lp["b2"] * lp["bn2_scale"] + lp["bn2_shift"]))
    H = params["gin"][0]["w2"].shape[1]
    aw1 = params["actor"]["w1"]
    actor = dict(w1c=aw1[:H, :], w1p=aw1[H:, :],
                 b1=params["actor"]["b1"], w2=params["actor"]["w2"], b2=params["actor"]["b2"])
    cr, cc = params["critic_r"], params["critic_c"]
    Hc = cr["w1"].shape[1]
    zeros = jnp.zeros((Hc, 1), jnp.float32)
    critic = dict(
        w1=jnp.concatenate([cr["w1"], cc["w1"]], axis=1),                       # (H, 2Hc)
        b1=jnp.concatenate([cr["b1"], cc["b1"]], axis=1),                       # (1, 2Hc)
        w2=jnp.concatenate([jnp.concatenate([cr["w2"], zeros], axis=0),
                            jnp.concatenate([zeros, cc["w2"]], axis=0)], axis=1),  # (2Hc, 2)
        b2=jnp.concatenate([cr["b2"], cc["b2"]], axis=1))                       # (1, 2)
    return dict(gin=gin, actor=actor, critic=critic)


# --------------------------------------------------------------------------------------
# Full forward (thin JAX glue: reshape, one-hot/mask prep, output split)
# --------------------------------------------------------------------------------------
def actor_critic_cost_forward(params, x, adj_blocks, gpool_w, candidate, mask, n_j, n_m):
    B = candidate.shape[0]
    N = n_j * n_m
    F = x.shape[-1]
    x3 = x.reshape(B, N, F)
    cand_onehot = (candidate[:, :, None]
                   == jnp.arange(N, dtype=candidate.dtype)[None, None, :]).astype(jnp.float32)
    mask3 = mask.astype(jnp.float32)[:, None, :]                   # (B, 1, n_j) lane-dense
    fp = prepare_fused_params(params)
    pi_ld, vv = fused_forward(x3, adj_blocks, gpool_w, cand_onehot, mask3, fp)
    pi = pi_ld[:, 0, :, None]                                      # (B, n_j, 1) for the caller
    v = vv[:, 0, 0:1]
    v_c = vv[:, 0, 1:2]
    return pi, v, v_c


# --------------------------------------------------------------------------------------
# Pure-JAX reference (same math, un-fused) for a correctness sanity check
# --------------------------------------------------------------------------------------
def reference_forward(params, x, adj_blocks, gpool_w, candidate, mask, n_j, n_m):
    B = candidate.shape[0]
    N = n_j * n_m
    F = x.shape[-1]
    h = x.reshape(B, N, F)
    for lp in params["gin"]:
        pooled = jnp.einsum("bij,bjf->bif", adj_blocks, h)
        z = jnp.maximum((pooled @ lp["w1"] + lp["b1"]) * lp["bn1_scale"] + lp["bn1_shift"], 0.0)
        z = z @ lp["w2"] + lp["b2"]
        h = jnp.maximum(z * lp["bn2_scale"] + lp["bn2_shift"], 0.0)
    hp = jnp.einsum("bon,bnh->boh", gpool_w, h)[:, 0, :]          # (B, H)
    cand_feat = h[jnp.arange(B)[:, None], candidate]              # (B, n_j, H)
    concat = jnp.concatenate(
        [cand_feat, jnp.broadcast_to(hp[:, None, :], cand_feat.shape)], axis=-1)
    a = params["actor"]
    scores = jnp.tanh(concat @ a["w1"] + a["b1"]) @ a["w2"] + a["b2"]
    scores = jnp.where(mask[..., None], -jnp.inf, scores)
    pi = jax.nn.softmax(scores, axis=1)

    def critic(p):
        return jnp.tanh(hp @ p["w1"] + p["b1"]) @ p["w2"] + p["b2"]

    return pi, critic(params["critic_r"]), critic(params["critic_c"])


if __name__ == "__main__":
    # small, module-consistent sizes
    n_j, n_m = 4, 2
    B = 2
    N = n_j * n_m                 # nodes per graph
    BN_total = B * N              # flattened node count
    input_dim = 2
    hidden_dim = 32
    num_layers = 3                # -> 2 GIN layers
    hidden_dim_actor = 32
    hidden_dim_critic = 32

    key = jax.random.PRNGKey(0)
    keys = jax.random.split(key, 20)
    kidx = 0

    def linear_params(k, fan_in, fan_out):
        kw, kb = jax.random.split(k)
        bound = 1.0 / float(fan_in) ** 0.5
        w = jax.random.uniform(kw, (fan_in, fan_out), jnp.float32, -bound, bound)
        b = jax.random.uniform(kb, (1, fan_out), jnp.float32, -bound, bound)
        return w, b

    def bn_affine(h, eps=1e-5):
        # eval-mode BatchNorm1d with default running stats (mean 0, var 1), identity affine
        scale = jnp.ones((1, h), jnp.float32) / jnp.sqrt(1.0 + eps)
        shift = jnp.zeros((1, h), jnp.float32)
        return scale, shift

    # GraphCNN params (num_mlp_layers_feature_extract = 2 per GIN layer)
    gin_params = []
    for layer in range(num_layers - 1):
        in_dim = input_dim if layer == 0 else hidden_dim
        w1, b1 = linear_params(keys[kidx], in_dim, hidden_dim); kidx += 1
        w2, b2 = linear_params(keys[kidx], hidden_dim, hidden_dim); kidx += 1
        s1, t1 = bn_affine(hidden_dim)
        s2, t2 = bn_affine(hidden_dim)
        gin_params.append(dict(w1=w1, b1=b1, bn1_scale=s1, bn1_shift=t1,
                               w2=w2, b2=b2, bn2_scale=s2, bn2_shift=t2))

    # actor (num_mlp_layers_actor = 2, input 2*hidden_dim)
    aw1, ab1 = linear_params(keys[kidx], 2 * hidden_dim, hidden_dim_actor); kidx += 1
    aw2, ab2 = linear_params(keys[kidx], hidden_dim_actor, 1); kidx += 1
    actor_params = dict(w1=aw1, b1=ab1, w2=aw2, b2=ab2)

    # critics (num_mlp_layers_critic = 2, input hidden_dim)
    crw1, crb1 = linear_params(keys[kidx], hidden_dim, hidden_dim_critic); kidx += 1
    crw2, crb2 = linear_params(keys[kidx], hidden_dim_critic, 1); kidx += 1
    critic_r_params = dict(w1=crw1, b1=crb1, w2=crw2, b2=crb2)
    ccw1, ccb1 = linear_params(keys[kidx], hidden_dim, hidden_dim_critic); kidx += 1
    ccw2, ccb2 = linear_params(keys[kidx], hidden_dim_critic, 1); kidx += 1
    critic_c_params = dict(w1=ccw1, b1=ccb1, w2=ccw2, b2=ccb2)

    params = dict(gin=gin_params, actor=actor_params,
                  critic_r=critic_r_params, critic_c=critic_c_params)

    # deterministic inputs: flattened node features, per-graph 0/1 adjacency (+ self loops),
    # average graph-pooling weights, candidate indices, action mask
    x = jax.random.normal(keys[kidx], (BN_total, input_dim), jnp.float32); kidx += 1
    adj_blocks = (jax.random.uniform(keys[kidx], (B, N, N)) < 0.3).astype(jnp.float32); kidx += 1
    adj_blocks = jnp.clip(adj_blocks + jnp.eye(N, dtype=jnp.float32)[None], 0.0, 1.0)
    gpool_w = jnp.full((B, 1, N), 1.0 / N, jnp.float32)           # average graph pooling
    candidate = jnp.tile(jnp.arange(n_j, dtype=jnp.int32) * n_m, (B, 1))   # (B, n_j)
    mask = jnp.array([[False, False, False, True],
                      [False, True, False, False]], dtype=bool)            # (B, n_j)

    pi, v, v_c = actor_critic_cost_forward(params, x, adj_blocks, gpool_w, candidate, mask,
                                           n_j=n_j, n_m=n_m)
    jax.block_until_ready((pi, v, v_c))

    assert pi.shape == (B, n_j, 1) and v.shape == (B, 1) and v_c.shape == (B, 1)
    assert bool(jnp.all(jnp.isfinite(pi)))

    pi_ref, v_ref, vc_ref = reference_forward(params, x, adj_blocks, gpool_w, candidate, mask,
                                              n_j, n_m)
    assert bool(jnp.allclose(pi, pi_ref, atol=1e-2, rtol=1e-2))
    assert bool(jnp.allclose(v, v_ref, atol=1e-2, rtol=1e-2))
    assert bool(jnp.allclose(v_c, vc_ref, atol=1e-2, rtol=1e-2))

    print("KERNEL_OK")
</pallas_src>

<mosaic_0001>
module attributes {stable_mosaic.version = 11 : i64} {
  func.func @kernel(%arg0: i32, %arg1: memref<1x8x2xf32, #tpu.memory_space<vmem>>, %arg2: memref<1x8x8xf32, #tpu.memory_space<vmem>>, %arg3: memref<1x1x8xf32, #tpu.memory_space<vmem>>, %arg4: memref<1x4x8xf32, #tpu.memory_space<vmem>>, %arg5: memref<1x1x4xf32, #tpu.memory_space<vmem>>, %arg6: memref<2x32xf32, #tpu.memory_space<vmem>>, %arg7: memref<1x32xf32, #tpu.memory_space<vmem>>, %arg8: memref<32x32xf32, #tpu.memory_space<vmem>>, %arg9: memref<1x32xf32, #tpu.memory_space<vmem>>, %arg10: memref<32x32xf32, #tpu.memory_space<vmem>>, %arg11: memref<1x32xf32, #tpu.memory_space<vmem>>, %arg12: memref<32x32xf32, #tpu.memory_space<vmem>>, %arg13: memref<1x32xf32, #tpu.memory_space<vmem>>, %arg14: memref<32x32xf32, #tpu.memory_space<vmem>>, %arg15: memref<32x32xf32, #tpu.memory_space<vmem>>, %arg16: memref<1x32xf32, #tpu.memory_space<vmem>>, %arg17: memref<32x1xf32, #tpu.memory_space<vmem>>, %arg18: memref<1x1xf32, #tpu.memory_space<vmem>>, %arg19: memref<32x64xf32, #tpu.memory_space<vmem>>, %arg20: memref<1x64xf32, #tpu.memory_space<vmem>>, %arg21: memref<64x2xf32, #tpu.memory_space<vmem>>, %arg22: memref<1x2xf32, #tpu.memory_space<vmem>>, %arg23: memref<1x1x4xf32, #tpu.memory_space<vmem>>, %arg24: memref<1x1x2xf32, #tpu.memory_space<vmem>>) attributes {dimension_semantics = [#tpu.dimension_semantics<parallel>], iteration_bounds = array<i64: 2>, scalar_prefetch = 0 : i64, scratch_operands = 0 : i64, tpu.core_type = #tpu.core_type<tc>, window_params = [{transform_indices = @transform_0, window_bounds = array<i64: 1, 8, 2>}, {transform_indices = @transform_1, window_bounds = array<i64: 1, 8, 8>}, {transform_indices = @transform_2, window_bounds = array<i64: 1, 1, 8>}, {transform_indices = @transform_3, window_bounds = array<i64: 1, 4, 8>}, {transform_indices = @transform_4, window_bounds = array<i64: 1, 1, 4>}, {pipeline_mode = #tpu.pipeline_mode<synchronous>, transform_indices = @transform_5, window_bounds = array<i64: 2, 32>}, {pipeline_mode = #tpu.pipeline_mode<synchronous>, transform_indices = @transform_6, window_bounds = array<i64: 1, 32>}, {pipeline_mode = #tpu.pipeline_mode<synchronous>, transform_indices = @transform_7, window_bounds = array<i64: 32, 32>}, {pipeline_mode = #tpu.pipeline_mode<synchronous>, transform_indices = @transform_8, window_bounds = array<i64: 1, 32>}, {pipeline_mode = #tpu.pipeline_mode<synchronous>, transform_indices = @transform_9, window_bounds = array<i64: 32, 32>}, {pipeline_mode = #tpu.pipeline_mode<synchronous>, transform_indices = @transform_10, window_bounds = array<i64: 1, 32>}, {pipeline_mode = #tpu.pipeline_mode<synchronous>, transform_indices = @transform_11, window_bounds = array<i64: 32, 32>}, {pipeline_mode = #tpu.pipeline_mode<synchronous>, transform_indices = @transform_12, window_bounds = array<i64: 1, 32>}, {pipeline_mode = #tpu.pipeline_mode<synchronous>, transform_indices = @transform_13, window_bounds = array<i64: 32, 32>}, {pipeline_mode = #tpu.pipeline_mode<synchronous>, transform_indices = @transform_14, window_bounds = array<i64: 32, 32>}, {pipeline_mode = #tpu.pipeline_mode<synchronous>, transform_indices = @transform_15, window_bounds = array<i64: 1, 32>}, {pipeline_mode = #tpu.pipeline_mode<synchronous>, transform_indices = @transform_16, window_bounds = array<i64: 32, 1>}, {pipeline_mode = #tpu.pipeline_mode<synchronous>, transform_indices = @transform_17, window_bounds = array<i64: 1, 1>}, {pipeline_mode = #tpu.pipeline_mode<synchronous>, transform_indices = @transform_18, window_bounds = array<i64: 32, 64>}, {pipeline_mode = #tpu.pipeline_mode<synchronous>, transform_indices = @transform_19, window_bounds = array<i64: 1, 64>}, {pipeline_mode = #tpu.pipeline_mode<synchronous>, transform_indices = @transform_20, window_bounds = array<i64: 64, 2>}, {pipeline_mode = #tpu.pipeline_mode<synchronous>, transform_indices = @transform_21, window_bounds = array<i64: 1, 2>}, {transform_indices = @transform_22, window_bounds = array<i64: 1, 1, 4>}, {transform_indices = @transform_23, window_bounds = array<i64: 1, 1, 2>}]} {
    %c0 = arith.constant 0 : index
    %c0_0 = arith.constant 0 : index
    %c0_1 = arith.constant 0 : index
    %0 = vector.load %arg2[%c0, %c0_0, %c0_1] : memref<1x8x8xf32, #tpu.memory_space<vmem>>, vector<1x8x8xf32>
    %c0_2 = arith.constant 0 : index
    %c0_3 = arith.constant 0 : index
    %c0_4 = arith.constant 0 : index
    %1 = vector.load %arg1[%c0_2, %c0_3, %c0_4] : memref<1x8x2xf32, #tpu.memory_space<vmem>>, vector<1x8x2xf32>
    %c0_5 = arith.constant 0 : index
    %c0_6 = arith.constant 0 : index
    %2 = vector.load %arg6[%c0_5, %c0_6] : memref<2x32xf32, #tpu.memory_space<vmem>>, vector<2x32xf32>
    %c0_7 = arith.constant 0 : index
    %c0_8 = arith.constant 0 : index
    %3 = vector.load %arg7[%c0_7, %c0_8] : memref<1x32xf32, #tpu.memory_space<vmem>>, vector<1x32xf32>
    %c0_9 = arith.constant 0 : index
    %c0_10 = arith.constant 0 : index
    %4 = vector.load %arg8[%c0_9, %c0_10] : memref<32x32xf32, #tpu.memory_space<vmem>>, vector<32x32xf32>
    %c0_11 = arith.constant 0 : index
    %c0_12 = arith.constant 0 : index
    %5 = vector.load %arg9[%c0_11, %c0_12] : memref<1x32xf32, #tpu.memory_space<vmem>>, vector<1x32xf32>
    "tpu.trace_start"() <{level = 10 : i32, message = "bij,bjf->bif"}> : () -> ()
    %cst = arith.constant dense<0.000000e+00> : vector<1x8x2xf32>
    %6 = tpu.matmul %0, %1, %cst {dimension_numbers = #tpu.dot_dimension_numbers<[2], [1], [1], [2], [0, 0, 0, 1, 1, 2], [0], [0]>} : vector<1x8x8xf32>, vector<1x8x2xf32>, vector<1x8x2xf32> -> vector<1x8x2xf32>
    "tpu.trace_stop"() : () -> ()
    %7 = vector.shape_cast %6 : vector<1x8x2xf32> to vector<8x2xf32>
    %cst_13 = arith.constant dense<0.000000e+00> : vector<8x32xf32>
    %8 = tpu.matmul %7, %2, %cst_13 {dimension_numbers = #tpu.dot_dimension_numbers<[1], [0], [0], [1], [0, 0, 1, 1], [], []>} : vector<8x2xf32>, vector<2x32xf32>, vector<8x32xf32> -> vector<8x32xf32>
    %9 = vector.broadcast %3 : vector<1x32xf32> to vector<8x32xf32>
    %10 = arith.addf %8, %9 : vector<8x32xf32>
    %cst_14 = arith.constant 0.000000e+00 : f32
    %11 = vector.broadcast %cst_14 : f32 to vector<8x32xf32>
    %12 = arith.maximumf %10, %11 : vector<8x32xf32>
    %cst_15 = arith.constant dense<0.000000e+00> : vector<8x32xf32>
    %13 = tpu.matmul %12, %4, %cst_15 {dimension_numbers = #tpu.dot_dimension_numbers<[1], [0], [0], [1], [0, 0, 1, 1], [], []>} : vector<8x32xf32>, vector<32x32xf32>, vector<8x32xf32> -> vector<8x32xf32>
    %14 = vector.broadcast %5 : vector<1x32xf32> to vector<8x32xf32>
    %15 = arith.addf %13, %14 : vector<8x32xf32>
    %cst_16 = arith.constant 0.000000e+00 : f32
    %16 = vector.broadcast %cst_16 : f32 to vector<8x32xf32>
    %17 = arith.maximumf %15, %16 : vector<8x32xf32>
    %18 = vector.shape_cast %17 : vector<8x32xf32> to vector<1x8x32xf32>
    %c0_17 = arith.constant 0 : index
    %c0_18 = arith.constant 0 : index
    %19 = vector.load %arg10[%c0_17, %c0_18] : memref<32x32xf32, #tpu.memory_space<vmem>>, vector<32x32xf32>
    %c0_19 = arith.constant 0 : index
    %c0_20 = arith.constant 0 : index
    %20 = vector.load %arg11[%c0_19, %c0_20] : memref<1x32xf32, #tpu.memory_space<vmem>>, vector<1x32xf32>
    %c0_21 = arith.constant 0 : index
    %c0_22 = arith.constant 0 : index
    %21 = vector.load %arg12[%c0_21, %c0_22] : memref<32x32xf32, #tpu.memory_space<vmem>>, vector<32x32xf32>
    %c0_23 = arith.constant 0 : index
    %c0_24 = arith.constant 0 : index
    %22 = vector.load %arg13[%c0_23, %c0_24] : memref<1x32xf32, #tpu.memory_space<vmem>>, vector<1x32xf32>
    "tpu.trace_start"() <{level = 10 : i32, message = "bij,bjf->bif"}> : () -> ()
    %cst_25 = arith.constant dense<0.000000e+00> : vector<1x8x32xf32>
    %23 = tpu.matmul %0, %18, %cst_25 {dimension_numbers = #tpu.dot_dimension_numbers<[2], [1], [1], [2], [0, 0, 0, 1, 1, 2], [0], [0]>} : vector<1x8x8xf32>, vector<1x8x32xf32>, vector<1x8x32xf32> -> vector<1x8x32xf32>
    "tpu.trace_stop"() : () -> ()
    %24 = vector.shape_cast %23 : vector<1x8x32xf32> to vector<8x32xf32>
    %cst_26 = arith.constant dense<0.000000e+00> : vector<8x32xf32>
    %25 = tpu.matmul %24, %19, %cst_26 {dimension_numbers = #tpu.dot_dimension_numbers<[1], [0], [0], [1], [0, 0, 1, 1], [], []>} : vector<8x32xf32>, vector<32x32xf32>, vector<8x32xf32> -> vector<8x32xf32>
    %26 = vector.broadcast %20 : vector<1x32xf32> to vector<8x32xf32>
    %27 = arith.addf %25, %26 : vector<8x32xf32>
    %cst_27 = arith.constant 0.000000e+00 : f32
    %28 = vector.broadcast %cst_27 : f32 to vector<8x32xf32>
    %29 = arith.maximumf %27, %28 : vector<8x32xf32>
    %cst_28 = arith.constant dense<0.000000e+00> : vector<8x32xf32>
    %30 = tpu.matmul %29, %21, %cst_28 {dimension_numbers = #tpu.dot_dimension_numbers<[1], [0], [0], [1], [0, 0, 1, 1], [], []>} : vector<8x32xf32>, vector<32x32xf32>, vector<8x32xf32> -> vector<8x32xf32>
    %31 = vector.broadcast %22 : vector<1x32xf32> to vector<8x32xf32>
    %32 = arith.addf %30, %31 : vector<8x32xf32>
    %cst_29 = arith.constant 0.000000e+00 : f32
    %33 = vector.broadcast %cst_29 : f32 to vector<8x32xf32>
    %34 = arith.maximumf %32, %33 : vector<8x32xf32>
    %35 = vector.shape_cast %34 : vector<8x32xf32> to vector<1x8x32xf32>
    %c0_30 = arith.constant 0 : index
    %c0_31 = arith.constant 0 : index
    %c0_32 = arith.constant 0 : index
    %36 = vector.load %arg3[%c0_30, %c0_31, %c0_32] : memref<1x1x8xf32, #tpu.memory_space<vmem>>, vector<1x1x8xf32>
    "tpu.trace_start"() <{level = 10 : i32, message = "bon,bnh->boh"}> : () -> ()
    %cst_33 = arith.constant dense<0.000000e+00> : vector<1x1x32xf32>
    %37 = tpu.matmul %36, %35, %cst_33 {dimension_numbers = #tpu.dot_dimension_numbers<[2], [1], [1], [2], [0, 0, 0, 1, 1, 2], [0], [0]>} : vector<1x1x8xf32>, vector<1x8x32xf32>, vector<1x1x32xf32> -> vector<1x1x32xf32>
    "tpu.trace_stop"() : () -> ()
    %38 = vector.shape_cast %37 : vector<1x1x32xf32> to vector<1x32xf32>
    %c0_34 = arith.constant 0 : index
    %c0_35 = arith.constant 0 : index
    %39 = vector.load %arg19[%c0_34, %c0_35] : memref<32x64xf32, #tpu.memory_space<vmem>>, vector<32x64xf32>
    %cst_36 = arith.constant dense<0.000000e+00> : vector<1x64xf32>
    %40 = tpu.matmul %38, %39, %cst_36 {dimension_numbers = #tpu.dot_dimension_numbers<[1], [0], [0], [1], [0, 0, 1, 1], [], []>} : vector<1x32xf32>, vector<32x64xf32>, vector<1x64xf32> -> vector<1x64xf32>
    %c0_37 = arith.constant 0 : index
    %c0_38 = arith.constant 0 : index
    %41 = vector.load %arg20[%c0_37, %c0_38] : memref<1x64xf32, #tpu.memory_space<vmem>>, vector<1x64xf32>
    %42 = arith.addf %40, %41 : vector<1x64xf32>
    %43 = math.tanh %42 : vector<1x64xf32>
    %c0_39 = arith.constant 0 : index
    %c0_40 = arith.constant 0 : index
    %44 = vector.load %arg21[%c0_39, %c0_40] : memref<64x2xf32, #tpu.memory_space<vmem>>, vector<64x2xf32>
    %cst_41 = arith.constant dense<0.000000e+00> : vector<1x2xf32>
    %45 = tpu.matmul %43, %44, %cst_41 {dimension_numbers = #tpu.dot_dimension_numbers<[1], [0], [0], [1], [0, 0, 1, 1], [], []>} : vector<1x64xf32>, vector<64x2xf32>, vector<1x2xf32> -> vector<1x2xf32>
    %c0_42 = arith.constant 0 : index
    %c0_43 = arith.constant 0 : index
    %46 = vector.load %arg22[%c0_42, %c0_43] : memref<1x2xf32, #tpu.memory_space<vmem>>, vector<1x2xf32>
    %47 = arith.addf %45, %46 : vector<1x2xf32>
    %48 = vector.shape_cast %47 : vector<1x2xf32> to vector<1x1x2xf32>
    %c0_44 = arith.constant 0 : index
    %c0_45 = arith.constant 0 : index
    %c0_46 = arith.constant 0 : index
    %49 = vector.load %arg24[%c0_44, %c0_45, %c0_46] : memref<1x1x2xf32, #tpu.memory_space<vmem>>, vector<1x1x2xf32>
    tpu.vector_store %arg24[%c0_44, %c0_45, %c0_46], %48 {strides = array<i32>} : memref<1x1x2xf32, #tpu.memory_space<vmem>>, vector<1x1x2xf32>,
    %c0_47 = arith.constant 0 : index
    %c0_48 = arith.constant 0 : index
    %c0_49 = arith.constant 0 : index
    %50 = vector.load %arg4[%c0_47, %c0_48, %c0_49] : memref<1x4x8xf32, #tpu.memory_space<vmem>>, vector<1x4x8xf32>
    "tpu.trace_start"() <{level = 10 : i32, message = "bjn,bnh->bjh"}> : () -> ()
    %cst_50 = arith.constant dense<0.000000e+00> : vector<1x4x32xf32>
    %51 = tpu.matmul %50, %35, %cst_50 {dimension_numbers = #tpu.dot_dimension_numbers<[2], [1], [1], [2], [0, 0, 0, 1, 1, 2], [0], [0]>} : vector<1x4x8xf32>, vector<1x8x32xf32>, vector<1x4x32xf32> -> vector<1x4x32xf32>
    "tpu.trace_stop"() : () -> ()
    %52 = vector.shape_cast %51 : vector<1x4x32xf32> to vector<4x32xf32>
    %c0_51 = arith.constant 0 : index
    %c0_52 = arith.constant 0 : index
    %53 = vector.load %arg14[%c0_51, %c0_52] : memref<32x32xf32, #tpu.memory_space<vmem>>, vector<32x32xf32>
    %cst_53 = arith.constant dense<0.000000e+00> : vector<4x32xf32>
    %54 = tpu.matmul %52, %53, %cst_53 {dimension_numbers = #tpu.dot_dimension_numbers<[1], [0], [0], [1], [0, 0, 1, 1], [], []>} : vector<4x32xf32>, vector<32x32xf32>, vector<4x32xf32> -> vector<4x32xf32>
    %c0_54 = arith.constant 0 : index
    %c0_55 = arith.constant 0 : index
    %55 = vector.load %arg15[%c0_54, %c0_55] : memref<32x32xf32, #tpu.memory_space<vmem>>, vector<32x32xf32>
    %cst_56 = arith.constant dense<0.000000e+00> : vector<1x32xf32>
    %56 = tpu.matmul %38, %55, %cst_56 {dimension_numbers = #tpu.dot_dimension_numbers<[1], [0], [0], [1], [0, 0, 1, 1], [], []>} : vector<1x32xf32>, vector<32x32xf32>, vector<1x32xf32> -> vector<1x32xf32>
    %57 = vector.shape_cast %54 : vector<4x32xf32> to vector<1x4x32xf32>
    %58 = vector.shape_cast %56 : vector<1x32xf32> to vector<1x1x32xf32>
    %59 = vector.broadcast %58 : vector<1x1x32xf32> to vector<1x4x32xf32>
    %60 = arith.addf %57, %59 : vector<1x4x32xf32>
    %c0_57 = arith.constant 0 : index
    %c0_58 = arith.constant 0 : index
    %61 = vector.load %arg16[%c0_57, %c0_58] : memref<1x32xf32, #tpu.memory_space<vmem>>, vector<1x32xf32>
    %62 = vector.shape_cast %61 : vector<1x32xf32> to vector<1x1x32xf32>
    %63 = vector.broadcast %62 : vector<1x1x32xf32> to vector<1x4x32xf32>
    %64 = arith.addf %60, %63 : vector<1x4x32xf32>
    %65 = math.tanh %64 : vector<1x4x32xf32>
    %66 = vector.shape_cast %65 : vector<1x4x32xf32> to vector<4x32xf32>
    %c0_59 = arith.constant 0 : index
    %c0_60 = arith.constant 0 : index
    %67 = vector.load %arg17[%c0_59, %c0_60] : memref<32x1xf32, #tpu.memory_space<vmem>>, vector<32x1xf32>
    %cst_61 = arith.constant dense<0.000000e+00> : vector<4x1xf32>
    %68 = tpu.matmul %66, %67, %cst_61 {dimension_numbers = #tpu.dot_dimension_numbers<[1], [0], [0], [1], [0, 0, 1, 1], [], []>} : vector<4x32xf32>, vector<32x1xf32>, vector<4x1xf32> -> vector<4x1xf32>
    %c0_62 = arith.constant 0 : index
    %c0_63 = arith.constant 0 : index
    %69 = vector.load %arg18[%c0_62, %c0_63] : memref<1x1xf32, #tpu.memory_space<vmem>>, vector<1x1xf32>
    %70 = vector.broadcast %69 : vector<1x1xf32> to vector<4x1xf32>
    %71 = arith.addf %68, %70 : vector<4x1xf32>
    %72 = vector.shape_cast %71 : vector<4x1xf32> to vector<1x4xf32>
    %c0_64 = arith.constant 0 : index
    %c0_65 = arith.constant 0 : index
    %c0_66 = arith.constant 0 : index
    %73 = vector.load %arg5[%c0_64, %c0_65, %c0_66] : memref<1x1x4xf32, #tpu.memory_space<vmem>>, vector<1x1x4xf32>
    %74 = vector.shape_cast %73 : vector<1x1x4xf32> to vector<1x4xf32>
    %cst_67 = arith.constant 0.000000e+00 : f32
    %75 = vector.broadcast %cst_67 : f32 to vector<1x4xf32>
    %76 = arith.cmpf one, %74, %75 : vector<1x4xf32>
    %cst_68 = arith.constant 0xFF800000 : f32
    %77 = vector.broadcast %cst_68 : f32 to vector<1x4xf32>
    %78 = arith.select %76, %77, %72 : vector<1x4xi1>, vector<1x4xf32>
    %cst_69 = arith.constant dense<0xFF800000> : vector<1xf32>
    %79 = vector.multi_reduction <maximumf>, %78, %cst_69 [1] : vector<1x4xf32> to vector<1xf32>
    %80 = vector.shape_cast %79 : vector<1xf32> to vector<1x1xf32>
    %81 = vector.broadcast %80 : vector<1x1xf32> to vector<1x4xf32>
    %82 = arith.subf %78, %81 : vector<1x4xf32>
    %83 = math.exp %82 : vector<1x4xf32>
    %cst_70 = arith.constant dense<0.000000e+00> : vector<1xf32>
    %84 = vector.multi_reduction <add>, %83, %cst_70 [1] : vector<1x4xf32> to vector<1xf32>
    %85 = vector.shape_cast %84 : vector<1xf32> to vector<1x1xf32>
    %86 = tpu.reciprocal %85 {approx = true} : vector<1x1xf32> -> vector<1x1xf32>
    %87 = vector.broadcast %86 : vector<1x1xf32> to vector<1x4xf32>
    %88 = arith.mulf %83, %87 : vector<1x4xf32>
    %89 = vector.shape_cast %88 : vector<1x4xf32> to vector<1x1x4xf32>
    %c0_71 = arith.constant 0 : index
    %c0_72 = arith.constant 0 : index
    %c0_73 = arith.constant 0 : index
    %90 = vector.load %arg23[%c0_71, %c0_72, %c0_73] : memref<1x1x4xf32, #tpu.memory_space<vmem>>, vector<1x1x4xf32>
    tpu.vector_store %arg23[%c0_71, %c0_72, %c0_73], %89 {strides = array<i32>} : memref<1x1x4xf32, #tpu.memory_space<vmem>>, vector<1x1x4xf32>,
    return
  }
  func.func @transform_0(%arg0: i32) -> (i32, i32, i32) {
    %c0_i32 = arith.constant 0 : i32
    %c0_i32_0 = arith.constant 0 : i32
    %c0_i32_1 = arith.constant 0 : i32
    return %arg0, %c0_i32, %c0_i32_0 : i32, i32, i32
  }
  func.func @transform_1(%arg0: i32) -> (i32, i32, i32) {
    %c0_i32 = arith.constant 0 : i32
    %c0_i32_0 = arith.constant 0 : i32
    %c0_i32_1 = arith.constant 0 : i32
    return %arg0, %c0_i32, %c0_i32_0 : i32, i32, i32
  }
  func.func @transform_2(%arg0: i32) -> (i32, i32, i32) {
    %c0_i32 = arith.constant 0 : i32
    %c0_i32_0 = arith.constant 0 : i32
    %c0_i32_1 = arith.constant 0 : i32
    return %arg0, %c0_i32, %c0_i32_0 : i32, i32, i32
  }
  func.func @transform_3(%arg0: i32) -> (i32, i32, i32) {
    %c0_i32 = arith.constant 0 : i32
    %c0_i32_0 = arith.constant 0 : i32
    %c0_i32_1 = arith.constant 0 : i32
    return %arg0, %c0_i32, %c0_i32_0 : i32, i32, i32
  }
  func.func @transform_4(%arg0: i32) -> (i32, i32, i32) {
    %c0_i32 = arith.constant 0 : i32
    %c0_i32_0 = arith.constant 0 : i32
    %c0_i32_1 = arith.constant 0 : i32
    return %arg0, %c0_i32, %c0_i32_0 : i32, i32, i32
  }
  func.func @transform_5(%arg0: i32) -> (i32, i32) {
    %c0_i32 = arith.constant 0 : i32
    %c0_i32_0 = arith.constant 0 : i32
    %c0_i32_1 = arith.constant 0 : i32
    return %c0_i32, %c0_i32_0 : i32, i32
  }
  func.func @transform_6(%arg0: i32) -> (i32, i32) {
    %c0_i32 = arith.constant 0 : i32
    %c0_i32_0 = arith.constant 0 : i32
    %c0_i32_1 = arith.constant 0 : i32
    return %c0_i32, %c0_i32_0 : i32, i32
  }
  func.func @transform_7(%arg0: i32) -> (i32, i32) {
    %c0_i32 = arith.constant 0 : i32
    %c0_i32_0 = arith.constant 0 : i32
    %c0_i32_1 = arith.constant 0 : i32
    return %c0_i32, %c0_i32_0 : i32, i32
  }
  func.func @transform_8(%arg0: i32) -> (i32, i32) {
    %c0_i32 = arith.constant 0 : i32
    %c0_i32_0 = arith.constant 0 : i32
    %c0_i32_1 = arith.constant 0 : i32
    return %c0_i32, %c0_i32_0 : i32, i32
  }
  func.func @transform_9(%arg0: i32) -> (i32, i32) {
    %c0_i32 = arith.constant 0 : i32
    %c0_i32_0 = arith.constant 0 : i32
    %c0_i32_1 = arith.constant 0 : i32
    return %c0_i32, %c0_i32_0 : i32, i32
  }
  func.func @transform_10(%arg0: i32) -> (i32, i32) {
    %c0_i32 = arith.constant 0 : i32
    %c0_i32_0 = arith.constant 0 : i32
    %c0_i32_1 = arith.constant 0 : i32
    return %c0_i32, %c0_i32_0 : i32, i32
  }
  func.func @transform_11(%arg0: i32) -> (i32, i32) {
    %c0_i32 = arith.constant 0 : i32
    %c0_i32_0 = arith.constant 0 : i32
    %c0_i32_1 = arith.constant 0 : i32
    return %c0_i32, %c0_i32_0 : i32, i32
  }
  func.func @transform_12(%arg0: i32) -> (i32, i32) {
    %c0_i32 = arith.constant 0 : i32
    %c0_i32_0 = arith.constant 0 : i32
    %c0_i32_1 = arith.constant 0 : i32
    return %c0_i32, %c0_i32_0 : i32, i32
  }
  func.func @transform_13(%arg0: i32) -> (i32, i32) {
    %c0_i32 = arith.constant 0 : i32
    %c0_i32_0 = arith.constant 0 : i32
    %c0_i32_1 = arith.constant 0 : i32
    return %c0_i32, %c0_i32_0 : i32, i32
  }
  func.func @transform_14(%arg0: i32) -> (i32, i32) {
    %c0_i32 = arith.constant 0 : i32
    %c0_i32_0 = arith.constant 0 : i32
    %c0_i32_1 = arith.constant 0 : i32
    return %c0_i32, %c0_i32_0 : i32, i32
  }
  func.func @transform_15(%arg0: i32) -> (i32, i32) {
    %c0_i32 = arith.constant 0 : i32
    %c0_i32_0 = arith.constant 0 : i32
    %c0_i32_1 = arith.constant 0 : i32
    return %c0_i32, %c0_i32_0 : i32, i32
  }
  func.func @transform_16(%arg0: i32) -> (i32, i32) {
    %c0_i32 = arith.constant 0 : i32
    %c0_i32_0 = arith.constant 0 : i32
    %c0_i32_1 = arith.constant 0 : i32
    return %c0_i32, %c0_i32_0 : i32, i32
  }
  func.func @transform_17(%arg0: i32) -> (i32, i32) {
    %c0_i32 = arith.constant 0 : i32
    %c0_i32_0 = arith.constant 0 : i32
    %c0_i32_1 = arith.constant 0 : i32
    return %c0_i32, %c0_i32_0 : i32, i32
  }
  func.func @transform_18(%arg0: i32) -> (i32, i32) {
    %c0_i32 = arith.constant 0 : i32
    %c0_i32_0 = arith.constant 0 : i32
    %c0_i32_1 = arith.constant 0 : i32
    return %c0_i32, %c0_i32_0 : i32, i32
  }
  func.func @transform_19(%arg0: i32) -> (i32, i32) {
    %c0_i32 = arith.constant 0 : i32
    %c0_i32_0 = arith.constant 0 : i32
    %c0_i32_1 = arith.constant 0 : i32
    return %c0_i32, %c0_i32_0 : i32, i32
  }
  func.func @transform_20(%arg0: i32) -> (i32, i32) {
    %c0_i32 = arith.constant 0 : i32
    %c0_i32_0 = arith.constant 0 : i32
    %c0_i32_1 = arith.constant 0 : i32
    return %c0_i32, %c0_i32_0 : i32, i32
  }
  func.func @transform_21(%arg0: i32) -> (i32, i32) {
    %c0_i32 = arith.constant 0 : i32
    %c0_i32_0 = arith.constant 0 : i32
    %c0_i32_1 = arith.constant 0 : i32
    return %c0_i32, %c0_i32_0 : i32, i32
  }
  func.func @transform_22(%arg0: i32) -> (i32, i32, i32) {
    %c0_i32 = arith.constant 0 : i32
    %c0_i32_0 = arith.constant 0 : i32
    %c0_i32_1 = arith.constant 0 : i32
    return %arg0, %c0_i32, %c0_i32_0 : i32, i32, i32
  }
  func.func @transform_23(%arg0: i32) -> (i32, i32, i32) {
    %c0_i32 = arith.constant 0 : i32
    %c0_i32_0 = arith.constant 0 : i32
    %c0_i32_1 = arith.constant 0 : i32
    return %arg0, %c0_i32, %c0_i32_0 : i32, i32, i32
  }
}

</mosaic_0001>

<bundles_post_ra>
// kernel: tpu_custom_call.1
= control target key start
LH: loop header
LB: loop body
LE: loop exit
PB: predicated region body
PF: predicated region fallthrough
CT: control target
= control target key end

     0   :  { %s3856_s0 = inlined_call_operand.vmem [shape: f32[2,8,2], index: 0, kind: input, shape index: {}]   ;;  %s3857_s1 = inlined_call_operand.hbm [shape: f32[2,8,8], index: 1, kind: input, shape index: {}]   ;;  %s3858_s2 = inlined_call_operand.hbm [shape: f32[2,1,8], index: 2, kind: input, shape index: {}]   ;;  %s3859_s3 = inlined_call_operand.hbm [shape: f32[2,4,8], index: 3, kind: input, shape index: {}]   ;;  %s3860_s4 = inlined_call_operand.hbm [shape: f32[2,1,4], index: 4, kind: input, shape index: {}]   ;;  %s3861_s5 = inlined_call_operand.hbm [shape: f32[2,32], index: 5, kind: input, shape index: {}]   ;;  %s3862_s6 = inlined_call_operand.hbm [shape: f32[1,32], index: 6, kind: input, shape index: {}]   ;;  %s3863_s7 = inlined_call_operand.vmem [shape: f32[32,32], index: 7, kind: input, shape index: {}]   ;;  %s3864_s8 = inlined_call_operand.hbm [shape: f32[1,32], index: 8, kind: input, shape index: {}]   ;;  %s3865_s9 = inlined_call_operand.vmem [shape: f32[32,32], index: 9, kind: input, shape index: {}]   ;;  %s3866_s10 = inlined_call_operand.hbm [shape: f32[1,32], index: 10, kind: input, shape index: {}]   ;;  %s3867_s11 = inlined_call_operand.vmem [shape: f32[32,32], index: 11, kind: input, shape index: {}]   ;;  %s3868_s12 = inlined_call_operand.vmem [shape: f32[1,32], index: 12, kind: input, shape index: {}]   ;;  %s3869_s13 = inlined_call_operand.vmem [shape: f32[32,32], index: 13, kind: input, shape index: {}]   ;;  %s3870_s14 = inlined_call_operand.vmem [shape: f32[32,32], index: 14, kind: input, shape index: {}]   ;;  %s3871_s15 = inlined_call_operand.vmem [shape: f32[1,32], index: 15, kind: input, shape index: {}]   ;;  %s3872_s16 = inlined_call_operand.vmem [shape: f32[32,1], index: 16, kind: input, shape index: {}]   ;;  %s3873_s17 = inlined_call_operand.<no memory space> [shape: f32[1,1], index: 17, kind: input, shape index: {}]   ;;  %s3874_s18 = inlined_call_operand.hbm [shape: f32[32,64], index: 18, kind: input, shape index: {}]   ;;  %s3875_s19 = inlined_call_operand.vmem [shape: f32[1,64], index: 19, kind: input, shape index: {}]   ;;  %s3876_s20 = inlined_call_operand.vmem [shape: f32[64,2], index: 20, kind: input, shape index: {}]   ;;  %s3877_s21 = inlined_call_operand.vmem [shape: f32[1,2], index: 21, kind: input, shape index: {}]   ;;  %s3878_s22 = inlined_call_operand.hbm [shape: f32[2,1,4], index: 22, kind: output, shape index: {0}]   ;;  %s3879_s23 = inlined_call_operand.hbm [shape: f32[2,1,2], index: 23, kind: output, shape index: {1}]  }
   0x1   :  { %3913 = sst [smem:[#allocation35_spill]] %s3856_s0  ;;  %v29_v0 = vstv %s3873_s17 }
   0x2   :  { %3914 = sst [smem:[#allocation36_spill]] %s3857_s1  ;;  %30 = vst [vmem:[#allocation2] sm:$0x1] %v29_v0 }
   0x3   :  { %3915 = sst [smem:[#allocation37_spill]] %s3858_s2 }
   0x4   :  { %3916 = sst [smem:[#allocation38_spill]] %s3859_s3 }
   0x5   :  { %3917 = sst [smem:[#allocation39_spill]] %s3860_s4 }
   0x6   :  { %3918 = sst [smem:[#allocation40_spill]] %s3861_s5 }
   0x7   :  { %3919 = sst [smem:[#allocation41_spill]] %s3862_s6 }
   0x8   :  { %3920 = sst [smem:[#allocation42_spill]] %s3863_s7 }
   0x9   :  { %3921 = sst [smem:[#allocation43_spill]] %s3864_s8 }
   0xa   :  { %3922 = sst [smem:[#allocation44_spill]] %s3866_s10 }
   0xb   :  { %3923 = sst [smem:[#allocation45_spill]] %s3869_s13 }
   0xc   :  { %3924 = sst [smem:[#allocation46_spill]] %s3870_s14 }
   0xd   :  { %3925 = sst [smem:[#allocation47_spill]] %s3871_s15 }
   0xe   :  { %3926 = sst [smem:[#allocation48_spill]] %s3872_s16 }
   0xf   :  { %3927 = sst [smem:[#allocation49_spill]] %s3875_s19 }
  0x10   :  { %3928 = sst [smem:[#allocation50_spill]] %s3876_s20 }
  0x11   :  { %3929 = sst [smem:[#allocation51_spill]] %s3877_s21 }
  0x12   :  { %3930 = sst [smem:[#allocation52_spill]] %s3878_s22 }
  0x13   :  { %3931 = sst [smem:[#allocation53_spill]] %s3879_s23 }
  0x14   :  { %31 = vsyncpa [#allocation4], 0 }
  0x15   :  { %33 = vsyncpa [#allocation4 + $0x1], 0 }
  0x16   :  { %34 = vsyncpa [#allocation7], 0 }
  0x17   :  { %36 = vsyncpa [#allocation7 + $0x1], 0 }
  0x18   :  { %37 = vsyncpa [#allocation10], 0 }
  0x19   :  { %39 = vsyncpa [#allocation10 + $0x1], 0 }
  0x1a   :  { %40 = vsyncpa [#allocation13], 0 }
  0x1b   :  { %41 = vsyncpa [#allocation16], 0 }
  0x1c   :  { %42 = vsyncpa [#allocation5], 0 }
  0x1d   :  { %44 = vsyncpa [#allocation5 + $0x1], 0 }
  0x1e   :  { %45 = vsyncpa [#allocation20], 0 }
  0x1f   :  { %47 = vsyncpa [#allocation20 + $0x1], 0  ;;  %s3233_s24 = smov 0   ;;  %s3235_s25 = smov 0  }
  0x20   :  { %s3237_s5 = smov 0   ;;  %s3239_s17 = smov 0  }
  0x21 LB: > { %3932 = sst [smem:[#allocation29_spill]] %s3078_s24  ;;  %s3092_s1 = smov [#allocation11]   ;;  %s3090_s17 = sphi %s3239_s17, %s3988_s17   ;;  %s3086_s5 = sphi %s3237_s5, %s3990_s5   ;;  %s3082_s25 = sphi %s3235_s25, %s3992_s25   ;;  %s3078_s24 = sphi %s3233_s24, %s3991_s24  }
  0x22   : > { %3933 = sst [smem:[#allocation30_spill]] %s3086_s5  ;;  %s610_s26 = sshll.u32 %s3092_s1, 4  ;;  %s611_s26 = int_to_ptr.vmem [resolvable:$true] %s610_s26 }
  0x23   : > { %s3254_s2 = sadd.s32 4294967295, %s3090_s17   ;;  %p2303_p0 = scmp.ge.s32.totalorder %s3090_s17, 1 }
  0x24   : > { %p3889_p1 = scmp.eq.s32.totalorder %s3254_s2, 0  ;;  %p597_p2 = scmp.lt.s32.totalorder %s3090_s17, 3 }
  0x25   : > { %s3093_s27 = smov [#allocation12]   ;;  %s3094_s28 = smov [#allocation15]  }
  0x26   : > { %p3259_p3 = pnand %p2303_p0, %p597_p2  ;;  %s621_s7 = sshll.u32 %s3093_s27, 4  ;;  %s3266_s7 = int_to_ptr.vmem [resolvable:$true] %s621_s7 }
  0x27   : > { %s649_s29 = sshll.u32 %s3094_s28, 4  ;;  %s3936_s30 = sld [smem:[#allocation40_spill]]  ;;  %s3274_s29 = int_to_ptr.vmem [resolvable:$true] %s649_s29 }
  0x28   : > { %s3934_s6 = scalar_select %p3259_p3, 1, 0 }
  0x29   : > { %p2611_p5 = pneg %p3259_p3 }
  0x2b   : > { %p3270_p6 = pnand %p2611_p5, %p3889_p1 }
  0x2d   : > { %s3935_s3 = scalar_select %p3270_p6, 1, 0 }
  0x2e   : > { %s2712_s1 = scalar_lea.hbm %s3936_s30, 32  ;;  %p3284_p8 = pneg %p3270_p6 }
  0x2f   : > { %p2713_p7 = scmp.ne.s32.totalorder %s3936_s30, %s2712_s1  ;;  %p2719_p11 = scmp.lt.u32.totalorder %s2712_s1, %s3936_s30 }
  0x30   : > { %s3937_s27 = scalar_select %p3284_p8, 1, 0 }
  0x31   : > { %p2715_p9 = pnand %p3284_p8, %p2713_p7 }
  0x33   : > { %p2716_p10 = pneg %p2715_p9 }
  0x35   : > { %p2721_p12 = pnand %p2719_p11, %p2716_p10 }
  0x37   : > { %2724 = shalt.err (!%p2721_p12)
}
  0x38   : > { %s2725_s0 = scalar_lea.vmem %s611_s26, 32  ;;  %p2733_p5 = scmp.lt.s32.totalorder %s611_s26, %s611_s26 }
  0x39   : > { %p2726_p13 = scmp.ne.s32.totalorder %s611_s26, %s2725_s0  ;;  %p2734_p4 = scmp.lt.s32.totalorder %s2725_s0, %s2725_s0 }
  0x3b   : > { %p2728_p0 = pnand %p2726_p13, %p3284_p8  ;;  %p2735_p1 = por %p2734_p4, %p2733_p5 }
  0x3d   : > { %p2729_p2 = pneg %p2728_p0 }
  0x3f   : > { %p2736_p3 = pnand %p2735_p1, %p2729_p2 }
  0x41   : > { %2739 = shalt.err (!%p2736_p3)
}
  0x42   : > { %2614 = dma.hbm_to_vmem [thread:$0]  (!%p3270_p6), %s3936_s30, 32, %s611_s26, [#allocation10]  }
  0x43   : > { %s3938_s1 = sld [smem:[#allocation41_spill]] }
  0x49   : > { %s2740_s28 = scalar_lea.hbm %s3938_s1, 16 }
  0x4a   : > { %p2741_p7 = scmp.ne.s32.totalorder %s3938_s1, %s2740_s28  ;;  %p2747_p1 = scmp.lt.u32.totalorder %s2740_s28, %s3938_s1 }
  0x4c   : > { %p2743_p9 = pnand %p2741_p7, %p3284_p8 }
  0x4e   : > { %p2744_p4 = pneg %p2743_p9 }
  0x50   : > { %p2749_p3 = pnand %p2747_p1, %p2744_p4 }
  0x52   : > { %2752 = shalt.err (!%p2749_p3)
}
  0x53   : > { %s2753_s26 = scalar_lea.vmem %s3266_s7, 16  ;;  %s2760_s16 = scalar_lea.vmem %s3266_s7, 32 }
  0x54   : > { %p2754_p10 = scmp.ne.s32.totalorder %s3266_s7, %s2753_s26  ;;  %p2761_p13 = scmp.lt.s32.totalorder %s3266_s7, %s3266_s7 }
  0x55   : > { %p2762_p0 = scmp.lt.s32.totalorder %s2760_s16, %s2753_s26 }
  0x56   : > { %p2756_p11 = pnand %p2754_p10, %p3284_p8 }
  0x57   : > { %p2763_p2 = por %p2762_p0, %p2761_p13 }
  0x58   : > { %p2757_p12 = pneg %p2756_p11 }
  0x5a   : > { %p2764_p5 = pnand %p2763_p2, %p2757_p12 }
  0x5c   : > { %2767 = shalt.err (!%p2764_p5)
}
  0x5d   : > { %2617 = dma.hbm_to_vmem [thread:$0]  (!%p3270_p6), %s3938_s1, 16, %s3266_s7, [#allocation13]  }
  0x5e   : > { %s3939_s10 = sld [smem:[#allocation44_spill]] }
  0x64   : > { %s2768_s15 = scalar_lea.hbm %s3939_s10, 16 }
  0x65   : > { %p2769_p7 = scmp.ne.s32.totalorder %s3939_s10, %s2768_s15  ;;  %p2775_p1 = scmp.lt.u32.totalorder %s2768_s15, %s3939_s10 }
  0x67   : > { %p2771_p9 = pnand %p2769_p7, %p3284_p8 }
  0x69   : > { %p2772_p4 = pneg %p2771_p9 }
  0x6b   : > { %p2777_p3 = pnand %p2775_p1, %p2772_p4 }
  0x6d   : > { %2780 = shalt.err (!%p2777_p3)
}
  0x6e   : > { %s2781_s7 = scalar_lea.vmem %s3274_s29, 16  ;;  %s2788_s16 = scalar_lea.vmem %s3274_s29, 32 }
  0x6f   : > { %p2782_p10 = scmp.ne.s32.totalorder %s3274_s29, %s2781_s7  ;;  %p2789_p13 = scmp.lt.s32.totalorder %s3274_s29, %s3274_s29 }
  0x70   : > { %p2790_p0 = scmp.lt.s32.totalorder %s2788_s16, %s2781_s7 }
  0x71   : > { %p2784_p11 = pnand %p2782_p10, %p3284_p8 }
  0x72   : > { %p2791_p2 = por %p2790_p0, %p2789_p13 }
  0x73   : > { %p2785_p12 = pneg %p2784_p11 }
  0x75   : > { %p2792_p5 = pnand %p2791_p2, %p2785_p12 }
  0x77   : > { %2795 = shalt.err (!%p2792_p5)
}
  0x78   : > { %2623 = dma.hbm_to_vmem [thread:$0]  (!%p3270_p6), %s3939_s10, 16, %s3274_s29, [#allocation16]  }
  0x79   : > { %s2302_s22 = sadd.s32 4294967294, %s3090_s17   ;;  %s3350_s23 = sadd.s32 1, %s3090_s17  }
  0x7a   : > { %3940 = sst [smem:[#allocation31_spill]] %s3350_s23  ;;  %s86_s15 = sadd.s32 1, %s3086_s5 }
  0x7b   : > { %s83_s4 = ssub.s32 %s3090_s17, %s3350_s23  ;;  %p93_p7 = scmp.ne.s32.totalorder %s3086_s5, %s3082_s25 }
  0x7c   : > { %p84_p9 = scmp.eq.s32.totalorder %s83_s4, 0  ;;  %p94_p4 = scmp.eq.s32.totalorder %s3090_s17, 0 }
  0x7d   : > { %p99_p1 = scmp.ne.s32.totalorder %s3082_s25, %s3078_s24  ;;  %p558_p3 = scmp.eq.s32.totalorder %s3254_s2, 1 }
  0x7e   : > { %s3362_s28 = scalar_select %p84_p9, %s3086_s5, %s86_s15  }
  0x7f   : > { %p95_p10 = por %p94_p4, %p93_p7  ;;  %p3942_p11 = scmp.eq.s32.totalorder %s3254_s2, 0 }
  0x80   : > { %3941 = sst [smem:[#allocation32_spill]] %s3362_s28  ;;  %p3370_p13 = por %p558_p3, %p93_p7 }
  0x81   : > { %p3366_p12 = por %p3942_p11, %p99_p1  ;;  %p564_p0 = scmp.eq.s32.totalorder %s2302_s22, 1 }
  0x82   : > { %s3944_s0 = scalar_select %p3370_p13, 1, 0 }
  0x83   : > { %s3943_s29 = scalar_select %p3366_p12, 1, 0 }
  0x84   : > { %3945 = sst [smem:[#allocation33_spill]] %s3944_s0  ;;  %p2652_p2 = scmp.lt.s32.totalorder %s3090_s17, 2 }
  0x85   : > { %s3376_s26 = sand.u32 1, %s3086_s5   ;;  %p3378_p5 = por %p564_p0, %p99_p1 }
  0x86   : > { %p3383_p9 = pnand %p2652_p2, %p95_p10  ;;  %s2312_s21 = sshll.u32 %s3090_s17, 4 }
  0x87   : > { %s3946_s7 = scalar_select %p3378_p5, 1, 0 }
  0x88   : > { %s3948_s14 = scalar_select %p3383_p9, 1, 0 }
  0x89   : > { %3947 = sst [smem:[#allocation34_spill]] %s3946_s7  ;;  %s3949_s1 = sld [smem:[#allocation37_spill]] }
  0x8a   : > { %s731_s22 = scalar_lea.vmem [#allocation6], %s3376_s26  ;;  %s3950_s5 = sld [smem:[#allocation39_spill]] }
  0x8b   : > { %s738_s30 = sshll.u32 %s731_s22, 4  ;;  %s3952_s24 = sand.u32 1, %s3090_s17   ;;  %s3394_s30 = int_to_ptr.vmem [resolvable:$true] %s738_s30 }
  0x8c   : > { %s3403_s0 = scalar_lea.sflag [#allocation7], %s3952_s24  ;;  %p3409_p4 = pneg %p3383_p9 }
  0x8f   : > { %s3391_s10 = scalar_lea.hbm %s3949_s1, %s2312_s21  ;;  %s2801_s28 = scalar_lea.hbm %s3949_s1, 32 }
  0x90   : > { %s3951_s23 = smov %s3950_s5  ;;  %s3399_s7 = scalar_lea.hbm %s3950_s5, %s2312_s21 }
  0x91   : > { %s2796_s19 = scalar_lea.hbm %s3391_s10, 16  ;;  %p2802_p10 = scmp.lt.u32.totalorder %s3391_s10, %s3949_s1 }
  0x92   : > { %p2797_p7 = scmp.ne.s32.totalorder %s3391_s10, %s2796_s19  ;;  %p2803_p11 = scmp.lt.u32.totalorder %s2801_s28, %s2796_s19 }
  0x93   : > { %p2805_p2 = scmp.lt.u32.totalorder %s2796_s19, %s3391_s10 }
  0x94   : > { %p2799_p1 = pnand %p3409_p4, %p2797_p7  ;;  %p2804_p0 = por %p2803_p11, %p2802_p10 }
  0x96   : > { %p2800_p3 = pneg %p2799_p1  ;;  %p2806_p5 = por %p2805_p2, %p2804_p0 }
  0x98   : > { %p2807_p13 = pnand %p2806_p5, %p2800_p3 }
  0x9a   : > { %2810 = shalt.err (!%p2807_p13)
}
  0x9b   : > { %s2811_s24 = scalar_lea.vmem %s3394_s30, 16  ;;  %s3095_s21 = smov [#allocation6]  }
  0x9c   : > { %p2812_p7 = scmp.ne.s32.totalorder %s3394_s30, %s2811_s24  ;;  %s2816_s4 = sshll.u32 %s3095_s21, 4  ;;  %s2817_s4 = int_to_ptr.vmem [resolvable:$false] %s2816_s4 }
  0x9d   : > { %s2818_s22 = scalar_lea.vmem %s2817_s4, 32  ;;  %p2819_p6 = scmp.lt.s32.totalorder %s3394_s30, %s2817_s4 }
  0x9e   : > { %p2814_p1 = pnand %p2812_p7, %p3409_p4  ;;  %p2820_p8 = scmp.lt.s32.totalorder %s2818_s22, %s2811_s24 }
  0xa0   : > { %p2815_p12 = pneg %p2814_p1  ;;  %p2821_p10 = por %p2820_p8, %p2819_p6 }
  0xa2   : > { %p2822_p11 = pnand %p2821_p10, %p2815_p12 }
  0xa4   : > { %2825 = shalt.err (!%p2822_p11)
}
  0xa5   : > { %2633 = dma.hbm_to_vmem [thread:$0]  (!%p3383_p9), %s3391_s10, 16, %s3394_s30, %s3403_s0  }
  0xa6   : > { %s3096_s19 = smov [#allocation14]   ;;  %s3097_s5 = smov [#allocation17]  }
  0xa7   : > { %s635_s28 = sshll.u32 %s3096_s19, 4  ;;  %s680_s16 = sshll.u32 %s3097_s5, 4  ;;  %s636_s28 = int_to_ptr.vmem [resolvable:$true] %s635_s28  ;;  %s3433_s16 = int_to_ptr.vmem [resolvable:$true] %s680_s16 }
  0xa8   : > { %s3954_s8 = sld [smem:[#allocation43_spill]]  ;;  %p3955_p8 = scmp.ne.s32.totalorder %s3937_s27, 0 }
  0xae   : > { %s2826_s24 = scalar_lea.hbm %s3954_s8, 16 }
  0xaf   : > { %p2827_p6 = scmp.ne.s32.totalorder %s3954_s8, %s2826_s24  ;;  %p2833_p5 = scmp.lt.u32.totalorder %s2826_s24, %s3954_s8 }
  0xb1   : > { %p2829_p12 = pnand %p2827_p6, %p3955_p8 }
  0xb3   : > { %p2830_p13 = pneg %p2829_p12 }
  0xb5   : > { %p2835_p3 = pnand %p2833_p5, %p2830_p13 }
  0xb7   : > { %2838 = shalt.err (!%p2835_p3)
}
  0xb8   : > { %s2839_s30 = scalar_lea.vmem %s636_s28, 16  ;;  %s2846_s19 = scalar_lea.vmem %s636_s28, 32 }
  0xb9   : > { %p2840_p0 = scmp.ne.s32.totalorder %s636_s28, %s2839_s30  ;;  %p2847_p1 = scmp.lt.s32.totalorder %s636_s28, %s636_s28 }
  0xba   : > { %p2848_p10 = scmp.lt.s32.totalorder %s2846_s19, %s2839_s30 }
  0xbb   : > { %p2842_p2 = pnand %p2840_p0, %p3955_p8 }
  0xbc   : > { %p2849_p11 = por %p2848_p10, %p2847_p1 }
  0xbd   : > { %p2843_p7 = pneg %p2842_p2 }
  0xbf   : > { %p2850_p9 = pnand %p2849_p11, %p2843_p7 }
  0xc1   : > { %2853 = shalt.err (!%p2850_p9)
}
  0xc2   : > { %p3956_p6 = scmp.ne.s32.totalorder %s3935_s3, 0  ;;  %s2854_s4 = scalar_lea.hbm %s3874_s18, 512 }
  0xc3   : > { %p2855_p12 = scmp.ne.s32.totalorder %s3874_s18, %s2854_s4  ;;  %p2861_p9 = scmp.lt.u32.totalorder %s2854_s4, %s3874_s18 }
  0xc4   : > { %2620 = dma.hbm_to_vmem [thread:$0]  (!%p3956_p6), %s3954_s8, 16, %s636_s28, [#allocation13]  }
  0xc5   : > { %p2857_p13 = pnand %p2855_p12, %p3955_p8 }
  0xc7   : > { %p2858_p5 = pneg %p2857_p13 }
  0xc9   : > { %p2863_p3 = pnand %p2861_p9, %p2858_p5 }
  0xcb   : > { %2866 = shalt.err (!%p2863_p3)
}
  0xcc   : > { %s2867_s28 = scalar_lea.vmem %s3433_s16, 512  ;;  %p2875_p1 = scmp.lt.s32.totalorder %s3433_s16, %s3433_s16 }
  0xcd   : > { %p2868_p0 = scmp.ne.s32.totalorder %s3433_s16, %s2867_s28  ;;  %p2876_p10 = scmp.lt.s32.totalorder %s2867_s28, %s2867_s28 }
  0xcf   : > { %p2870_p2 = pnand %p2868_p0, %p3955_p8  ;;  %p2877_p11 = por %p2876_p10, %p2875_p1 }
  0xd1   : > { %p2871_p7 = pneg %p2870_p2 }
  0xd3   : > { %p2878_p12 = pnand %p2877_p11, %p2871_p7 }
  0xd5   : > { %2881 = shalt.err (!%p2878_p12)
}
  0xd6   : > { %s3098_s19 = smov 128   ;;  %s3099_s1 = smov 8  }
  0xd7   : > { %2626 = dma.hbm_to_vmem [thread:$0]  (!%p3956_p6), %s3874_s18, 512, %s3433_s16, [#allocation16], %s3098_s19, %s3098_s19, %s3099_s1  }
  0xd8   : > { %s2310_s13 = sshll.u32 %s3376_s26, 3  ;;  %s2311_s21 = sshll.u32 %s3090_s17, 7 }
  0xd9   : > { %s3957_s22 = sld [smem:[#allocation36_spill]]  ;;  %s714_s30 = scalar_lea.vmem [#allocation3], %s2310_s13 }
  0xda   : > { %s721_s28 = sshll.u32 %s714_s30, 4  ;;  %s2313_s3 = sshll.u32 %s3376_s26, 2  ;;  %s3483_s28 = int_to_ptr.vmem [resolvable:$true] %s721_s28 }
  0xdb   : > { %s711_s8 = scalar_lea.sflag [#allocation4], %s3376_s26 }
  0xdf   : > { %s3481_s10 = scalar_lea.hbm %s3957_s22, %s2311_s21  ;;  %s2887_s1 = scalar_lea.hbm %s3957_s22, 256 }
  0xe0   : > { %s2882_s20 = scalar_lea.hbm %s3481_s10, 128  ;;  %p2888_p5 = scmp.lt.u32.totalorder %s3481_s10, %s3957_s22 }
  0xe1   : > { %p2883_p8 = scmp.ne.s32.totalorder %s3481_s10, %s2882_s20  ;;  %p2889_p9 = scmp.lt.u32.totalorder %s2887_s1, %s2882_s20 }
  0xe2   : > { %p2891_p0 = scmp.lt.u32.totalorder %s2882_s20, %s3481_s10 }
  0xe3   : > { %p2885_p6 = pnand %p2883_p8, %p3409_p4  ;;  %p2890_p3 = por %p2889_p9, %p2888_p5 }
  0xe5   : > { %p2886_p13 = pneg %p2885_p6  ;;  %p2892_p2 = por %p2891_p0, %p2890_p3 }
  0xe7   : > { %p2893_p7 = pnand %p2892_p2, %p2886_p13 }
  0xe9   : > { %2896 = shalt.err (!%p2893_p7)
}
  0xea   : > { %s2897_s13 = scalar_lea.vmem %s3483_s28, 128  ;;  %s3100_s21 = smov [#allocation3]  }
  0xeb   : > { %p2898_p1 = scmp.ne.s32.totalorder %s3483_s28, %s2897_s13  ;;  %s2902_s4 = sshll.u32 %s3100_s21, 4  ;;  %s2903_s4 = int_to_ptr.vmem [resolvable:$false] %s2902_s4 }
  0xec   : > { %s2904_s24 = scalar_lea.vmem %s2903_s4, 256  ;;  %p2905_p12 = scmp.lt.s32.totalorder %s3483_s28, %s2903_s4 }
  0xed   : > { %p2900_p10 = pnand %p2898_p1, %p3409_p4  ;;  %p2906_p8 = scmp.lt.s32.totalorder %s2904_s24, %s2897_s13 }
  0xef   : > { %p2901_p11 = pneg %p2900_p10  ;;  %p2907_p6 = por %p2906_p8, %p2905_p12 }
  0xf1   : > { %p2908_p5 = pnand %p2907_p6, %p2901_p11 }
  0xf3   : > { %2911 = shalt.err (!%p2908_p5)
}
  0xf4   : > { %p3958_p13 = scmp.ne.s32.totalorder %s3948_s14, 0  ;;  %s2314_s20 = sshll.u32 %s3090_s17, 6 }
  0xf5   : > { %s3959_s19 = sld [smem:[#allocation38_spill]]  ;;  %s749_s5 = scalar_lea.vmem [#allocation8], %s2313_s3 }
  0xf6   : > { %2630 = dma.hbm_to_vmem [thread:$0]  (!%p3958_p13), %s3481_s10, 128, %s3483_s28, %s711_s8  }
  0xf7   : > { %s756_s27 = sshll.u32 %s749_s5, 4  ;;  %s757_s27 = int_to_ptr.vmem [resolvable:$true] %s756_s27 }
  0xfb   : > { %s3512_s1 = scalar_lea.hbm %s3959_s19, %s2314_s20  ;;  %s2917_s28 = scalar_lea.hbm %s3959_s19, 128 }
  0xfc   : > { %s2912_s13 = scalar_lea.hbm %s3512_s1, 64  ;;  %p2918_p2 = scmp.lt.u32.totalorder %s3512_s1, %s3959_s19 }
  0xfd   : > { %p2913_p9 = scmp.ne.s32.totalorder %s3512_s1, %s2912_s13  ;;  %p2919_p7 = scmp.lt.u32.totalorder %s2917_s28, %s2912_s13 }
  0xfe   : > { %p2921_p10 = scmp.lt.u32.totalorder %s2912_s13, %s3512_s1 }
  0xff   : > { %p2915_p3 = pnand %p2913_p9, %p3409_p4  ;;  %p2920_p1 = por %p2919_p7, %p2918_p2 }
 0x101   : > { %p2916_p0 = pneg %p2915_p3  ;;  %p2922_p11 = por %p2921_p10, %p2920_p1 }
 0x103   : > { %p2923_p12 = pnand %p2922_p11, %p2916_p0 }
 0x105   : > { %2926 = shalt.err (!%p2923_p12)
}
 0x106   : > { %s2927_s3 = scalar_lea.vmem %s757_s27, 64  ;;  %s3101_s24 = smov [#allocation8]  }
 0x107   : > { %p2928_p8 = scmp.ne.s32.totalorder %s757_s27, %s2927_s3  ;;  %s2932_s20 = sshll.u32 %s3101_s24, 4  ;;  %s2933_s20 = int_to_ptr.vmem [resolvable:$false] %s2932_s20 }
 0x108   : > { %s2934_s30 = scalar_lea.vmem %s2933_s20, 128  ;;  %p2935_p9 = scmp.lt.s32.totalorder %s757_s27, %s2933_s20 }
 0x109   : > { %p2930_p6 = pnand %p2928_p8, %p3409_p4  ;;  %p2936_p3 = scmp.lt.s32.totalorder %s2934_s30, %s2927_s3 }
 0x10b   : > { %p2931_p5 = pneg %p2930_p6  ;;  %p2937_p13 = por %p2936_p3, %p2935_p9 }
 0x10d   : > { %p2938_p2 = pnand %p2937_p13, %p2931_p5 }
 0x10f   : > { %2941 = shalt.err (!%p2938_p2)
}
 0x110   : > { %p3960_p7 = scmp.ne.s32.totalorder %s3948_s14, 0  ;;  %s766_s16 = scalar_lea.vmem [#allocation9], %s3376_s26 }
 0x111   : > { %s773_s5 = sshll.u32 %s766_s16, 4  ;;  %s3961_s13 = sand.u32 1, %s3090_s17   ;;  %s774_s5 = int_to_ptr.vmem [resolvable:$true] %s773_s5 }
 0x112   : > { %2636 = dma.hbm_to_vmem [thread:$0]  (!%p3960_p7), %s3512_s1, 64, %s757_s27, %s3403_s0  }
 0x113   : > { %s764_s8 = scalar_lea.sflag [#allocation10], %s3961_s13  ;;  %s2942_s10 = scalar_lea.hbm %s3399_s7, 16 }
 0x114   : > { %p2943_p13 = scmp.ne.s32.totalorder %s3399_s7, %s2942_s10  ;;  %s2947_s4 = scalar_lea.hbm %s3951_s23, 32 }
 0x115   : > { %p2948_p10 = scmp.lt.u32.totalorder %s3399_s7, %s3951_s23  ;;  %p2949_p11 = scmp.lt.u32.totalorder %s2947_s4, %s2942_s10 }
 0x116   : > { %p2945_p0 = pnand %p2943_p13, %p3409_p4  ;;  %p2951_p8 = scmp.lt.u32.totalorder %s2942_s10, %s3399_s7 }
 0x117   : > { %p2950_p12 = por %p2949_p11, %p2948_p10 }
 0x118   : > { %p2946_p1 = pneg %p2945_p0 }
 0x119   : > { %p2952_p6 = por %p2951_p8, %p2950_p12 }
 0x11b   : > { %p2953_p5 = pnand %p2952_p6, %p2946_p1 }
 0x11d   : > { %2956 = shalt.err (!%p2953_p5)
}
 0x11e   : > { %s2957_s0 = scalar_lea.vmem %s774_s5, 16  ;;  %s3102_s26 = smov [#allocation9]  }
 0x11f   : > { %p2958_p9 = scmp.ne.s32.totalorder %s774_s5, %s2957_s0  ;;  %s2962_s1 = sshll.u32 %s3102_s26, 4  ;;  %s2963_s1 = int_to_ptr.vmem [resolvable:$false] %s2962_s1 }
 0x120   : > { %s2964_s27 = scalar_lea.vmem %s2963_s1, 32  ;;  %p2965_p13 = scmp.lt.s32.totalorder %s774_s5, %s2963_s1 }
 0x121   : > { %p2960_p3 = pnand %p2958_p9, %p3409_p4  ;;  %p2966_p0 = scmp.lt.s32.totalorder %s2964_s27, %s2957_s0 }
 0x123   : > { %p2961_p2 = pneg %p2960_p3  ;;  %p2967_p7 = por %p2966_p0, %p2965_p13 }
 0x125   : > { %p2968_p10 = pnand %p2967_p7, %p2961_p2 }
 0x127   : > { %2971 = shalt.err (!%p2968_p10)
}
 0x128   : > { %p3962_p11 = scmp.ne.s32.totalorder %s3948_s14, 0  ;;  %p3963_p1 = scmp.ne.s32.totalorder %s3934_s6, 0 }
 0x129   : > { %s3557_s15 = sand.u32 (!%p3963_p1), 1, %s3082_s25   ;;  %p3964_p4 = scmp.ne.s32.totalorder (!%p3963_p1), %s3943_s29, 0 }
 0x12a   : > { %2639 = dma.hbm_to_vmem [thread:$0]  (!%p3962_p11), %s3399_s7, 16, %s774_s5, %s764_s8  }
 0x12b   : > { %782 = sbr.rel (%p3963_p1) target bundleno = 2987 (0xbab), region = 108  ;;  %s2317_s20 = sshll.u32 (!%p3963_p1), %s3557_s15, 3 }
 0x12c   : > { %s785_s30 = scalar_lea.sflag (!%p3963_p1), [#allocation4], %s3557_s15  ;;  %s3561_s16 = scalar_lea.vmem (!%p3963_p1), [#allocation3], %s2317_s20 }
 0x132   : > { %3045 = dma.done.wait (%p3964_p4), %s785_s30, 128  }
 0x133   : > { %3047 = vsyncadd (%p3964_p4), %s785_s30, 4294967168  ;;  %s793_s6 = sand.u32 1, %s3254_s2   ;;  %s796_s14 = scalar_lea.vmem [#allocation6], %s3557_s15 }
 0x134   : > { %s794_s7 = scalar_lea.sflag [#allocation7], %s793_s6 }
 0x135   : > { %3049 = dma.done.wait (%p3964_p4), %s794_s7, 80  }
 0x136   : > { %3051 = vsyncadd (%p3964_p4), %s794_s7, 4294967216  ;;  %s2318_s5 = sshll.u32 %s3557_s15, 2  ;;  %s811_s8 = scalar_lea.sflag [#allocation10], %s793_s6 }
 0x137   : > { %s3574_s13 = scalar_lea.vmem [#allocation8], %s2318_s5  ;;  %s813_s10 = scalar_lea.vmem [#allocation9], %s3557_s15 }
 0x138   : > { %3053 = dma.done.wait (%p3964_p4), %s811_s8, 16  }
 0x139   : > { %3055 = vsyncadd (%p3964_p4), %s811_s8, 4294967280  ;;  %p3965_p7 = scmp.eq.s32.totalorder %s3254_s2, 0 }
 0x13b   : > { %3057 = dma.done.wait (%p3965_p7), [#allocation10], 32   ;;  %p3966_p12 = pmov %p3965_p7 }
 0x13c   : > { %p3967_p8 = pmov %p3965_p7 }
 0x13d   : > { %3059 = vsyncadd (%p3966_p12), [#allocation10], 4294967264 }
 0x13e   : > { %3061 = dma.done.wait (%p3967_p8), [#allocation13], 32   ;;  %p3968_p6 = pmov %p3965_p7 }
 0x140   : > { %3063 = vsyncadd (%p3968_p6), [#allocation13], 4294967264  ;;  %p3969_p5 = pmov %p3968_p6 }
 0x142   : > { %3065 = dma.done.wait (%p3969_p5), [#allocation16], 528   ;;  %p3970_p9 = pmov %p3969_p5 }
 0x143   : > { %p916_p3 = scmp.lt.s32.totalorder %s3254_s2, 1  ;;  %v3103_v1 = vmov 0.0   ;;  %vm3104_vm0 = vmmov 0   ;;  %s3971_s3 = sld [smem:[#allocation35_spill]]  ;;  %vm929_vm1 = vcmask 64512   ;;  %v920_v3 = vld [vmem:[%s3561_s16] sm:$0xff] }
 0x144   : > { %3067 = vsyncadd (%p3970_p9), [#allocation16], 4294966768  ;;  %2404 = vmatprep.subr.mxu0 %v3103_v1  ;;  %2406 = vmatprep.mubr.msk.f32.mxu0 %vm3104_vm0, %v3103_v1  ;;  %v922_v4 = vld [vmem:[#allocation11] sm:$0x3]  ;;  %vm1013_vm2 = vcmask 1041408   ;;  %s3972_s1 = sld [smem:[#allocation42_spill]] }
 0x145   : > { %s917_s29 = scalar_select %p916_p3, %s3254_s2, 1  ;;  %2409 = vmatprep.subr.mxu1 %v3103_v1  ;;  %2411 = vmatprep.mubr.msk.f32.mxu1 %vm3104_vm0, %v3103_v1  ;;  %v3105_v7 = vmov 0.0|0.0   ;;  %vm1009_vm3 = vcmask 15360   ;;  %v2326_v14 = vld [vmem:[#allocation12] ss:$0 sm:$0xff]  ;;  %vm1094_vm4 = vcmask 261120  }
 0x146   : > { %2410 = vmatpush3.msk.msra.mxu1 %vm1013_vm2, %v922_v4  ;;  %v2329_v19 = vld [vmem:[#allocation14] ss:$0 sm:$0xff]  ;;  %v1170_v22 = vld [vmem:[%s3865_s9 + $0x8] sm:$0xff]  ;;  %v1171_v27 = vld [vmem:[%s3865_s9 + $0x10] sm:$0xff]  ;;  %s3973_s21 = sld [smem:[#allocation50_spill]]  ;;  %s3976_s6 = sld [smem:[#allocation46_spill]] }
 0x147   : > { %s2324_s28 = sshll.u32 %s917_s29, 3  ;;  %2425 = vmatprep.subr.mxu1 %v3103_v1  ;;  %v1169_v21 = vld [vmem:[%s3865_s9] sm:$0xff]  ;;  %v1172_v28 = vld [vmem:[%s3865_s9 + $0x18] sm:$0xff]  ;;  %v1175_v31 = vld [vmem:[%s3867_s11 + $0x8] sm:$0xff]  ;;  %vm1571_vm5 = vcmask 523264   ;;  %s3977_s0 = sld [smem:[#allocation48_spill]] }
 0x148   : > { %v2532_v26 = vpack.c.bf16 %v1170_v22, %v1169_v21  ;;  %v2535_v29 = vpack.c.bf16 %v1172_v28, %v1171_v27  ;;  %v1174_v30 = vld [vmem:[%s3867_s11] sm:$0xff]  ;;  %v1176_v35 = vld [vmem:[%s3867_s11 + $0x10] sm:$0xff]  ;;  %v1177_v36 = vld [vmem:[%s3867_s11 + $0x18] sm:$0xff]  ;;  %s3978_s8 = sld [smem:[#allocation51_spill]]  ;;  %vm1645_vm6 = vcmask 8192   ;;  %s915_s29 = scalar_lea.vmem [#allocation19], %s3557_s15 }
 0x149   : > { %s919_s24 = scalar_lea.vmem %s3971_s3, %s2324_s28  ;;  %v2538_v32 = vpack.c.bf16 %v1175_v31, %v1174_v30  ;;  %v2541_v37 = vpack.c.bf16 %v1177_v36, %v1176_v35  ;;  %v2332_v38 = vld [vmem:[#allocation15] ss:$0 sm:$0xff]  ;;  %v1483_v43 = vld [vmem:[#allocation17] sm:$0xff]  ;;  %v1484_v44 = vld [vmem:[#allocation17 + $0x8] sm:$0xff]  ;;  %s3974_s28 = sld [smem:[#allocation45_spill]]  ;;  %vm2046_vm8 = vcmask 24576  }
 0x14a   : > { %v921_v2 = vld [vmem:[%s919_s24] sm:$0xff]  ;;  %v925_v6 = vld [vmem:[%s3972_s1 + $0x8] sm:$0xff]  ;;  %v926_v11 = vld [vmem:[%s3972_s1 + $0x10] sm:$0xff]  ;;  %v2544_v46 = vpack.c.bf16 %v1484_v44, %v1483_v43  ;;  %s3980_s24 = sld [smem:[#allocation33_spill]]  ;;  %s3981_s20 = sld [smem:[#allocation53_spill]] }
 0x14b   : > { %2405 = vmatpush3.msra.mxu0 %v921_v2  ;;  %v924_v5 = vld [vmem:[%s3972_s1] sm:$0xff]  ;;  %v927_v12 = vld [vmem:[%s3972_s1 + $0x18] sm:$0xff]  ;;  %s2089_s30 = sshll.u32 %s915_s29, 4  ;;  %s2064_s16 = scalar_lea.sflag [#allocation20], %s3557_s15  ;;  %s2090_s30 = int_to_ptr.vmem [resolvable:$true] %s2089_s30 }
 0x14c   : > { %2407 = vmatmul.mubr.msk.f32.vlgmr.msra.gmra.mrb[0].mxu0 %vm929_vm1, %v920_v3  ;;  %2525 = vmatprep.subr.bf16.mxu0 %v3105_v7  ;;  %v2526_v8 = vpack.c.bf16 %v925_v6, %v924_v5  ;;  %v2529_v13 = vpack.c.bf16 %v927_v12, %v926_v11  ;;  %v1485_v45 = vld [vmem:[#allocation17 + $0x10] sm:$0xff]  ;;  %v1486_v47 = vld [vmem:[#allocation17 + $0x18] sm:$0xff]  ;;  %v1563_v56 = vld [vmem:[%s3973_s21 + $0x8] sm:$0xff]  ;;  %s2972_s7 = scalar_lea.vmem %s2090_s30, 16  ;;  %s3108_s5 = smov [#allocation19]  }
 0x14d   : > { %2422 = vmatprep.mubr.msk.f32.mxu0 %vm3104_vm0, %v3103_v1  ;;  %v2547_v48 = vpack.c.bf16 %v1486_v47, %v1485_v45  ;;  %v2334_v49 = vld [vmem:[%s3868_s12] ss:$0 sm:$0xff]  ;;  %v1647_v60 = vld [vmem:[%s3574_s13] sm:$0xf]  ;;  %v1567_v2 = vld [vmem:[%s3973_s21 + $0x28] sm:$0xff]  ;;  %s3975_s13 = sld [smem:[#allocation49_spill]]  ;;  %p2973_p2 = scmp.ne.s32.totalorder %s2090_s30, %s2972_s7 }
 0x14e   : > { %2527 = vmatpush3.bf16.msra.mxu0 %v2526_v8  ;;  %v1409_v54 = vld [vmem:[%s796_s14] sm:$0x1]  ;;  %v1564_v61 = vld [vmem:[%s3973_s21 + $0x10] sm:$0xff]  ;;  %v1565_v62 = vld [vmem:[%s3973_s21 + $0x18] sm:$0xff]  ;;  %s3979_s14 = sld [smem:[#allocation47_spill]]  ;;  %v3106_v47 = vmov 0  }
 0x14f   : > { %2528 = vmatprep.subr.bf16.mxu0 %v3105_v7  ;;  %v1562_v55 = vld [vmem:[%s3973_s21] sm:$0xff]  ;;  %v2553_v63 = vpack.c.bf16 %v1565_v62, %v1564_v61  ;;  %v1568_v4 = vld [vmem:[%s3973_s21 + $0x30] sm:$0xff]  ;;  %v1569_v5 = vld [vmem:[%s3973_s21 + $0x38] sm:$0xff]  ;;  %2703 = vset.pattern.permute.xlu0 %v3106_v47 }
 0x150   : > { %v2550_v57 = vpack.c.bf16 %v1563_v56, %v1562_v55  ;;  %v1566_v0 = vld [vmem:[%s3973_s21 + $0x20] sm:$0xff]  ;;  %v2559_v6 = vpack.c.bf16 %v1569_v5, %v1568_v4  ;;  %v1723_v11 = vld [vmem:[%s3974_s28 + $0x10] sm:$0xff]  ;;  %v1724_v12 = vld [vmem:[%s3974_s28 + $0x18] sm:$0xff]  ;;  %p3982_p13 = scmp.ne.s32.totalorder %s3980_s24, 0 }
 0x151   : > { %v1721_v8 = vld [vmem:[%s3974_s28] sm:$0xff]  ;;  %v1799_v21 = vld [vmem:[%s3976_s6 + $0x8] sm:$0xff] }
 0x152   : > { %2530 = vmatpush3.bf16.msra.mxu0 %v2529_v13  ;;  %v2565_v13 = vpack.c.bf16 %v1724_v12, %v1723_v11  ;;  %v1886_v27 = vld [vmem:[%s3977_s0] sm:$0xff]  ;;  %v1887_v28 = vld [vmem:[%s3977_s0 + $0x8] sm:$0xff]  ;;  %p2974_p0 = pnand %p2973_p2, %p3982_p13 }
 0x153   : > { %2537 = vmatprep.subr.bf16.mxu0 %v3105_v7  ;;  %v2574_v30 = vpack.c.bf16 %v1887_v28, %v1886_v27  ;;  %v1570_v35 = vld [vmem:[%s3978_s8] sm:$0x1]  ;;  %s2976_s8 = sshll.u32 %s3108_s5, 4  ;;  %s2977_s8 = int_to_ptr.vmem [resolvable:$false] %s2976_s8 }
 0x154   : > { %v2342_v43 = vld [vmem:[%s3979_s14] ss:$0 sm:$0xff]  ;;  %p2975_p10 = pneg %p2974_p0  ;;  %s2978_s4 = scalar_lea.vmem %s2977_s8, 32 }
 0x155   : > { %p2979_p11 = scmp.lt.s32.totalorder %s2090_s30, %s2977_s8  ;;  %p2980_p1 = scmp.lt.s32.totalorder %s2978_s4, %s2972_s7 }
 0x157   : > { %p2981_p4 = por %p2980_p1, %p2979_p11 }
 0x159   : > { %p2982_p7 = pnand %p2981_p4, %p2975_p10 }
 0x21f   : > { %v999_v9 = vpop.f32.mrb[0].mxu0 }
 0x220   : > { %v2408_v10 = vpop.f32.mrb[1].mxu0  ;;  %2412 = vmatmul.mubr.msk.f32.vlgmr.msra.gmra.mrb[0].mxu1 %vm1009_vm3, %v999_v9  ;;  %v1722_v9 = vld [vmem:[%s3974_s28 + $0x8] sm:$0xff] }
 0x221   : > { %2427 = vmatprep.mubr.msk.f32.mxu1 %vm3104_vm0, %v3103_v1  ;;  %v2562_v10 = vpack.c.bf16 %v1722_v9, %v1721_v8  ;;  %v1970_v8 = vld [vmem:[%s813_s10] sm:$0x1]  ;;  %s2346_s10 = sshll.u32 %s3254_s2, 4 }
 0x222   : > { %vm1971_vm7 = vcmp.ne.f32.partialorder %v1970_v8, 0.0 }
 0x2f3   : > { %v1083_v15 = vpop.f32.mrb[0].mxu1 }
 0x2f4   : > { %v1084_v16 = vadd.f32 %v2326_v14, %v1083_v15  ;;  %v2413_v17 = vpop.f32.mrb[1].mxu1  ;;  %v1487_v14 = vld [vmem:[%s3975_s13] sm:$0x1]  ;;  %s3783_s13 = scalar_lea.hbm %s3981_s20, %s2346_s10 }
 0x2f6   : > { %v1087_v18 = vmax.f32 %v1084_v16, 0.0 }
 0x2f8   : > { %2423 = vmatmul.mubr.msk.f32.vlgmr.msra.gmra.mrb[2].mxu0 %vm1094_vm4, %v1087_v18 }
 0x2f9   : > { %2449 = vmatprep.mubr.msk.f32.mxu0 %vm3104_vm0, %v3103_v1  ;;  %2539 = vmatpush3.bf16.msra.mxu0 %v2538_v32 }
 0x2fa   : > { %2540 = vmatprep.subr.bf16.mxu0 %v3105_v7 }
 0x2fd   : > { %2542 = vmatpush3.bf16.msra.mxu0 %v2541_v37 }
 0x2fe   : > { %2543 = vmatprep.subr.bf16.mxu0 %v3105_v7 }
 0x3cb   : > { %v1164_v20 = vpop.f32.mrb[2].mxu0 }
 0x3cc   : > { %v1165_v23 = vadd.f32 %v2329_v19, %v1164_v20  ;;  %v2424_v24 = vpop.f32.mrb[3].mxu0  ;;  %v1798_v20 = vld [vmem:[%s3976_s6] sm:$0xff] }
 0x3cd   : > { %v2568_v22 = vpack.c.bf16 %v1799_v21, %v1798_v20  ;;  %v1801_v24 = vld [vmem:[%s3976_s6 + $0x18] sm:$0xff] }
 0x3ce   : > { %v1168_v25 = vmax.f32 %v1165_v23, 0.0  ;;  %v1800_v23 = vld [vmem:[%s3976_s6 + $0x10] sm:$0xff] }
 0x3d0   : > { %2426 = vmatpush3.msra.mxu1 %v1168_v25 }
 0x3d1   : > { %2428 = vmatmul.mubr.msk.f32.vlgmr.msra.gmra.mrb[2].mxu1 %vm929_vm1, %v920_v3  ;;  %2531 = vmatprep.subr.bf16.mxu1 %v3105_v7  ;;  %v2556_v3 = vpack.c.bf16 %v1567_v2, %v1566_v0 }
 0x3d2   : > { %2533 = vmatpush3.bf16.msra.mxu1 %v2532_v26  ;;  %2438 = vmatprep.mubr.msk.f32.mxu1 %vm3104_vm0, %v3103_v1  ;;  %v2571_v26 = vpack.c.bf16 %v1801_v24, %v1800_v23 }
 0x3d3   : > { %2534 = vmatprep.subr.bf16.mxu1 %v3105_v7 }
 0x3d6   : > { %2536 = vmatpush3.bf16.msra.mxu1 %v2535_v29  ;;  %v1888_v29 = vld [vmem:[%s3977_s0 + $0x10] sm:$0xff] }
 0x3d7   : > { %2452 = vmatprep.subr.mxu1 %v3103_v1 }
 0x4a4   : > { %v1245_v33 = vpop.f32.mrb[2].mxu1 }
 0x4a5   : > { %v2429_v34 = vpop.f32.mrb[3].mxu1  ;;  %2439 = vmatmul.mubr.msk.f32.vlgmr.msra.gmra.mrb[4].mxu1 %vm1094_vm4, %v1245_v33 }
 0x4a6   : > { %2454 = vmatprep.mubr.msk.f32.mxu1 %vm3104_vm0, %v3103_v1  ;;  %v1872_v34 = vlaneseq }
 0x578   : > { %v1324_v39 = vpop.f32.mrb[4].mxu1 }
 0x579   : > { %v1325_v40 = vadd.f32 %v2332_v38, %v1324_v39  ;;  %v2440_v41 = vpop.f32.mrb[5].mxu1  ;;  %v1873_v39 = vshrl.u32 %v1872_v34, 7 }
 0x57b   : > { %v1328_v42 = vmax.f32 %v1325_v40, 0.0  ;;  %v1874_v40 = vsub.s32 0, %v1873_v39 }
 0x57d   : > { %2450 = vmatmul.mubr.msk.f32.vlgmr.msra.gmra.mrb[4].mxu0 %vm1094_vm4, %v1328_v42 }
 0x57e   : > { %2465 = vmatprep.mubr.msk.f32.mxu0 %vm3104_vm0, %v3103_v1  ;;  %2545 = vmatpush3.bf16.msra.mxu0 %v2544_v46 }
 0x57f   : > { %2546 = vmatprep.subr.bf16.mxu0 %v3105_v7 }
 0x582   : > { %2548 = vmatpush3.bf16.msra.mxu0 %v2547_v48  ;;  %v3107_v48 = vmov 1966171168  }
 0x583   : > { %2487 = vmatprep.subr.mxu0 %v3103_v1 }
 0x650   : > { %v1404_v50 = vpop.f32.mrb[4].mxu0 }
 0x651   : > { %v1405_v51 = vadd.f32 %v2334_v49, %v1404_v50  ;;  %v2451_v52 = vpop.f32.mrb[5].mxu0  ;;  %v1974_v49 = vunpack.c.l.s4 %v3107_v48 }
 0x653   : > { %v1408_v53 = vmax.f32 %v1405_v51, 0.0  ;;  %v1975_v50 = vunpack.c.0.s8 %v1974_v49  ;;  %v2343_v51 = vld [vmem:[#allocation2] ss:$0 sm:$0xff] }
 0x655   : > { %2453 = vmatpush3.msra.mxu1 %v1408_v53  ;;  %v1978_v52 = vsub.s32 %v1975_v50, %v1873_v39 }
 0x656   : > { %2455 = vmatmul.mubr.msk.f32.vlgmr.msra.gmra.mrb[6].mxu1 %vm929_vm1, %v1409_v54  ;;  %2549 = vmatprep.subr.bf16.mxu1 %v3105_v7 }
 0x657   : > { %2484 = vmatprep.mubr.msk.f32.mxu1 %vm3104_vm0, %v3103_v1  ;;  %2551 = vmatpush3.bf16.msra.mxu1 %v2550_v57 }
 0x658   : > { %2552 = vmatprep.subr.bf16.mxu1 %v3105_v7 }
 0x65b   : > { %2554 = vmatpush3.bf16.msra.mxu1 %v2553_v63 }
 0x65c   : > { %2555 = vmatprep.subr.bf16.mxu1 %v3105_v7 }
 0x65f   : > { %2557 = vmatpush3.bf16.msra.mxu1 %v2556_v3  ;;  %v2025_v3 = vand.u32 127, %v1872_v34 }
 0x660   : > { %2558 = vmatprep.subr.bf16.mxu1 %v3105_v7 }
 0x661   : > { %v2028_v4 = vsub.s32 %v2025_v3, %v1873_v39 }
 0x663   : > { %2560 = vmatpush3.bf16.msra.mxu1 %v2559_v6 }
 0x664   : > { %2567 = vmatprep.subr.bf16.mxu1 %v3105_v7 }
 0x729   : > { %v1479_v58 = vpop.f32.mrb[6].mxu1 }
 0x72a   : > { %2466 = vmatmul.mubr.msk.f32.vlgmr.msra.gmra.mrb[6].mxu0 %vm1094_vm4, %v1479_v58  ;;  %v2456_v59 = vpop.f32.mrb[7].mxu1 }
 0x72b   : > { %2488 = vmatpush3.msra.mxu0 %v1408_v53  ;;  %2489 = vmatprep.mubr.msk.f32.mxu0 %vm3104_vm0, %v3103_v1 }
 0x72c   : > { %2561 = vmatprep.subr.bf16.mxu0 %v3105_v7 }
 0x72e   : > { %2490 = vmatmul.mubr.msk.f32.vlgmr.msra.gmra.mrb[8].mxu0 %vm929_vm1, %v1647_v60 }
 0x72f   : > { %2500 = vmatprep.mubr.msk.f32.mxu0 %vm3104_vm0, %v3103_v1  ;;  %2563 = vmatpush3.bf16.msra.mxu0 %v2562_v10 }
 0x730   : > { %2564 = vmatprep.subr.bf16.mxu0 %v3105_v7 }
 0x733   : > { %2566 = vmatpush3.bf16.msra.mxu0 %v2565_v13 }
 0x734   : > { %2573 = vmatprep.subr.bf16.mxu0 %v3105_v7 }
 0x7fd   : > { %v1557_v15 = vpop.f32.mrb[6].mxu0 }
 0x7fe   : > { %v1558_v16 = vadd.f32 %v1557_v15, %v1487_v14  ;;  %v2467_v17 = vpop.f32.mrb[7].mxu0 }
 0x800   : > { %2704 = vtanh.f32 %v1558_v16 }
 0x801   : > { %v1717_v18 = vpop.f32.mrb[8].mxu0 }
 0x802   : > { %2501 = vmatmul.mubr.msk.f32.vlgmr.msra.gmra.mrb[10].mxu0 %vm1094_vm4, %v1717_v18  ;;  %v2491_v19 = vpop.f32.mrb[9].mxu0 }
 0x803   : > { %2522 = vmatprep.mubr.msk.f32.mxu0 %vm3104_vm0, %v3103_v1  ;;  %2575 = vmatpush3.bf16.msra.mxu0 %v2574_v30 }
 0x804   : > { %2576 = vmatprep.subr.bf16.mxu0 %v3105_v7 }
 0x80a   : > { %v2705_v25 = vpop.eup %2704 }
 0x80b   : > { %2485 = vmatmul.mubr.msk.f32.vlgmr.msra.gmra.mrb[8].mxu1 %vm1571_vm5, %v2705_v25 }
 0x80c   : > { %2569 = vmatpush3.bf16.msra.mxu1 %v2568_v22  ;;  %2511 = vmatprep.mubr.msk.f32.mxu1 %vm3104_vm0, %v3103_v1  ;;  %v1889_v1 = vld [vmem:[%s3977_s0 + $0x18] sm:$0xff] }
 0x80d   : > { %2570 = vmatprep.subr.bf16.mxu1 %v3105_v7  ;;  %v2577_v31 = vpack.c.bf16 %v1889_v1, %v1888_v29 }
 0x80f   : > { %2578 = vmatpush3.bf16.msra.mxu0 %v2577_v31 }
 0x810   : > { %2572 = vmatpush3.bf16.msra.mxu1 %v2571_v26 }
 0x813   : > { %2512 = vmatmul.mubr.msk.f32.vlgmr.msra.gmra.mrb[10].mxu1 %vm1094_vm4, %v1479_v58 }
 0x8d5   : > { %v1794_v32 = vpop.f32.mrb[10].mxu0 }
 0x8d6   : > { %v2502_v33 = vpop.f32.mrb[11].mxu0 }
 0x8de   : > { %v1641_v36 = vpop.f32.mrb[8].mxu1 }
 0x8df   : > { %v1642_v37 = vadd.f32 %v1641_v36, %v1570_v35  ;;  %v2486_v38 = vpop.f32.mrb[9].mxu1 }
 0x8e1   : > { %1646 = vst.msk [vmem:[%s915_s29] sm:$0x1] %vm1645_vm6, %v1642_v37 }
 0x8e6   : > { %v1868_v41 = vpop.f32.mrb[10].mxu1 }
 0x8e7   : > { %v1875_v42 = vrot.slane %v1868_v41, %v1874_v40  ;;  %v2513_v7 = vpop.f32.mrb[11].mxu1 }
 0x8e9   : > { %v1876_v44 = vadd.f32 %v1875_v42, %v1794_v32 }
 0x8eb   : > { %v1884_v45 = vadd.f32 %v2342_v43, %v1876_v44 }
 0x8ed   : > { %2706 = vtanh.f32 %v1884_v45 }
 0x8f7   : > { %v2707_v46 = vpop.eup %2706 }
 0x8f8   : > { %2523 = vmatmul.mubr.msk.f32.vlgmr.msra.gmra.mrb[12].mxu0 %vm1094_vm4, %v2707_v46 }
 0x9cb   : > { %v1966_v53 = vpop.f32.mrb[12].mxu0 }
 0x9cc   : > { %v1967_v54 = vadd.f32 %v2343_v51, %v1966_v53  ;;  %v2524_v55 = vpop.f32.mrb[13].mxu0 }
 0x9ce   : > { %v1979_v56 = vrot.slane %v1967_v54, %v1978_v52 }
 0x9d0   : > { %v1980_v57 = vcombine.high %v1979_v56, %v1979_v56  ;;  %v1987_v58 = vrot.slane %v1979_v56, %v1978_v52 }
 0x9d2   : > { %v1994_v59 = vrot.slane %v1980_v57, %v1978_v52 }
 0x9d4   : > { %v1997_v60 = vcombine.low %v1987_v58, %v1994_v59  ;;  %v2345_v61 = vcombine.high %v1987_v58, %v1994_v59 }
 0x9d6   : > { %v2005_v62 = vrot.slane %v1997_v60, %v1978_v52  ;;  %v2012_v63 = vrot.slane %v2345_v61, %v1978_v52 }
 0x9d8   : > { %v2013_v0 = vcombine.low %v2005_v62, %v2012_v63 }
 0x9da   : > { %v2020_v2 = vrot.slane %v2013_v0, %v1978_v52 }
 0x9dc   : > { %2022 = vperm.xlu0 %2703, %v2020_v2  }
 0xa5b   : > { %v2023_v5 = vpop.permute.xlu0 %2022 }
 0xa5c   : > { %v2029_v6 = vrot.slane %v2023_v5, %v2028_v4 }
 0xa5e   : > { %v2036_v9 = vrot.slane %v2029_v6, %v1978_v52 }
 0xa60   : > { %v2043_v10 = vrot.slane %v2036_v9, %v1978_v52 }
 0xa62   : > { %v2045_v11 = vsel %vm1971_vm7, -inf, %v2043_v10 }
 0xa63   : > { %v2047_v12 = vsel %vm2046_vm8, %v2045_v11, -inf }
 0xa64   : > { %2048 = vmax.xlane.f32.xlu0 %v2047_v12 }
 0xaf1   : > { %v2049_v13 = vpop.xlane.xlu0 %2048 }
 0xaf2   : > { %v2050_v14 = vsub.f32 %v2045_v11, %v2049_v13 }
 0xaf4   : > { %v2051_v15 = vmul.f32 1.442695, %v2050_v14 }
 0xaf6   : > { %2708 = vpow2.f32 %v2051_v15 }
 0xb00   : > { %v2709_v16 = vpop.eup %2708 }
 0xb01   : > { %v2053_v17 = vsel %vm2046_vm8, %v2709_v16, 0.0 }
 0xb02   : > { %2054 = vadd.xlane.f32.xlu1 %v2053_v17 }
 0xb03   : > { %2985 = shalt.err (!%p2982_p7)
}
 0xb04   : > { %s2986_s29 = scalar_lea.hbm %s3783_s13, 16  ;;  %s2990_s26 = scalar_lea.hbm %s3981_s20, 32 }
 0xb05   : > { %p2987_p12 = scmp.ne.s32.totalorder %s3783_s13, %s2986_s29  ;;  %p2991_p5 = scmp.lt.u32.totalorder %s3783_s13, %s3981_s20 }
 0xb06   : > { %p2992_p9 = scmp.lt.u32.totalorder %s2990_s26, %s2986_s29  ;;  %p2994_p2 = scmp.lt.u32.totalorder %s2986_s29, %s3783_s13 }
 0xb07   : > { %p2988_p8 = pnand %p2987_p12, %p3982_p13 }
 0xb08   : > { %p2993_p3 = por %p2992_p9, %p2991_p5 }
 0xb09   : > { %p2989_p6 = pneg %p2988_p8 }
 0xb0a   : > { %p2995_p0 = por %p2994_p2, %p2993_p3 }
 0xb0c   : > { %p2996_p10 = pnand %p2995_p0, %p2989_p6 }
 0xb0e   : > { %2999 = shalt.err (!%p2996_p10)
}
 0xb0f   : > { %2608 = dma.vmem_to_hbm [thread:$0]  (%p3982_p13), %s2090_s30, 16, %s3783_s13, %s2064_s16  }
 0xb10   : > { %s909_s7 = scalar_lea.vmem [#allocation18], %s3557_s15  ;;  %s3983_s3 = sld [smem:[#allocation52_spill]] }
 0xb11   : > { %s2076_s8 = sshll.u32 %s909_s7, 4  ;;  %s2060_s13 = scalar_lea.sflag [#allocation5], %s3557_s15  ;;  %s3813_s8 = int_to_ptr.vmem [resolvable:$true] %s2076_s8 }
 0xb12   : > { %s3000_s30 = scalar_lea.vmem %s3813_s8, 16  ;;  %s3109_s16 = smov [#allocation18]  }
 0xb13   : > { %p3001_p11 = scmp.ne.s32.totalorder %s3813_s8, %s3000_s30  ;;  %s3004_s2 = sshll.u32 %s3109_s16, 4  ;;  %s3005_s2 = int_to_ptr.vmem [resolvable:$false] %s3004_s2 }
 0xb14   : > { %s3006_s26 = scalar_lea.vmem %s3005_s2, 32  ;;  %p3007_p7 = scmp.lt.s32.totalorder %s3813_s8, %s3005_s2 }
 0xb15   : > { %p3002_p1 = pnand %p3001_p11, %p3982_p13  ;;  %p3008_p12 = scmp.lt.s32.totalorder %s3006_s26, %s3000_s30 }
 0xb16   : > { %s3811_s14 = scalar_lea.hbm %s3983_s3, %s2346_s10 }
 0xb17   : > { %p3003_p4 = pneg %p3002_p1  ;;  %p3009_p8 = por %p3008_p12, %p3007_p7 }
 0xb19   : > { %p3010_p6 = pnand %p3009_p8, %p3003_p4 }
 0xb8f   : > { %v2055_v18 = vpop.xlane.xlu1 %2054 }
 0xb90   : > { %2710 = vrcp.f32 %v2055_v18 }
 0xb9a   : > { %v2711_v19 = vpop.eup %2710 }
 0xb9b   : > { %v2057_v20 = vmul.f32 %v2711_v19, %v2709_v16 }
 0xb9d   : > { %2058 = vst.msk [vmem:[%s909_s7] sm:$0x1] %vm2046_vm8, %v2057_v20 }
 0xb9e   : > { %3013 = shalt.err (!%p3010_p6)
}
 0xb9f   : > { %s3014_s15 = scalar_lea.hbm %s3811_s14, 16  ;;  %s3018_s5 = scalar_lea.hbm %s3983_s3, 32 }
 0xba0   : > { %p3015_p5 = scmp.ne.s32.totalorder %s3811_s14, %s3014_s15  ;;  %p3019_p2 = scmp.lt.u32.totalorder %s3811_s14, %s3983_s3 }
 0xba1   : > { %p3020_p0 = scmp.lt.u32.totalorder %s3018_s5, %s3014_s15  ;;  %p3022_p11 = scmp.lt.u32.totalorder %s3014_s15, %s3811_s14 }
 0xba2   : > { %p3016_p9 = pnand %p3015_p5, %p3982_p13 }
 0xba3   : > { %p3021_p10 = por %p3020_p0, %p3019_p2 }
 0xba4   : > { %p3017_p3 = pneg %p3016_p9 }
 0xba5   : > { %p3023_p1 = por %p3022_p11, %p3021_p10 }
 0xba7   : > { %p3024_p4 = pnand %p3023_p1, %p3017_p3 }
 0xba9   : > { %3027 = shalt.err (!%p3024_p4)
}
 0xbaa   : > { %2607 = dma.vmem_to_hbm [thread:$0]  (%p3982_p13), %s3813_s8, 16, %s3811_s14, %s2060_s13  }
 0xbab PF: > { %s3984_s29 = sld [smem:[#allocation29_spill]]  ;;  %s3985_s30 = sld [smem:[#allocation34_spill]] }
 0xbac   : > { %p3987_p12 = scmp.ge.s32.totalorder %s3090_s17, 2 }
 0xbb1   : > { %s2101_s16 = sand.u32 1, %s3984_s29   ;;  %p3986_p7 = scmp.ne.s32.totalorder %s3985_s30, 0 }
 0xbb2   : > { %s2102_s2 = scalar_lea.sflag [#allocation5], %s2101_s16 }
 0xbb3   : > { %p2641_p8 = pnand %p3987_p12, %p3986_p7 }
 0xbb5   : > { %3069 = dma.done.wait (!%p2641_p8), %s2102_s2, 16  }
 0xbb6   : > { %3071 = vsyncadd (!%p2641_p8), %s2102_s2, 4294967280  ;;  %s2110_s26 = scalar_lea.sflag [#allocation20], %s2101_s16 }
 0xbb7   : > { %3073 = dma.done.wait (!%p2641_p8), %s2110_s26, 16  }
 0xbb8   : > { %3075 = vsyncadd (!%p2641_p8), %s2110_s26, 4294967280  ;;  %s3988_s17 = sld [smem:[#allocation31_spill]]  ;;  %s3989_s15 = sld [smem:[#allocation30_spill]] }
 0xbb9   : > { %s3990_s5 = sld [smem:[#allocation32_spill]]  ;;  %s3991_s24 = smov %s3082_s25 }
 0xbbe   : > { %p50_p13 = scmp.ge.s32.totalorder %s3988_s17, 4   ;;  %s3992_s25 = smov %s3989_s15 }
 0xbc0   :  { %52 = sbr.rel (!%p50_p13) target bundleno = 33 (0x21), region = 230 }
 0xbc7   :  { %2114 = vsyncpa [#allocation4], 1 }
 0xbc8   :  { %2116 = vsyncpa [#allocation4 + $0x1], 1 }
 0xbc9   :  { %2117 = vsyncpa [#allocation7], 1 }
 0xbca   :  { %2119 = vsyncpa [#allocation7 + $0x1], 1 }
 0xbcb   :  { %2120 = vsyncpa [#allocation10], 1 }
 0xbcc   :  { %2122 = vsyncpa [#allocation10 + $0x1], 1 }
 0xbcd   :  { %2123 = vsyncpa [#allocation13], 1 }
 0xbce   :  { %2124 = vsyncpa [#allocation16], 1 }
 0xbcf   :  { %2125 = vsyncpa [#allocation5], 1 }
 0xbd0   :  { %2127 = vsyncpa [#allocation5 + $0x1], 1 }
 0xbd1   :  { %2128 = vsyncpa [#allocation20], 1 }
 0xbd2   :  { %2130 = vsyncpa [#allocation20 + $0x1], 1 }

</bundles_post_ra>
